<compile_context>
chip_gen: v7x
topology: tpu7x:2x2x1
jax: 0.10.0
libtpu: 0.0.40
codegen_flags: <defaults>
</compile_context>

<pallas_src>
import jax
import jax.numpy as jnp
from jax.experimental import pallas as pl
from jax.experimental.pallas import tpu as pltpu


# ---------------------------- helpers ----------------------------

def _round_up(x, m):
    return (x + m - 1) // m * m


def _vmem_limit_bytes(needed_bytes):
    # Explicit VMEM budget: 2x headroom over the computed working set, floored at the
    # v5e scoped default (16 MiB) and capped at v7x physical per-core VMEM (64 MiB).
    return int(min(64 * 1024 * 1024, max(16 * 1024 * 1024, 2 * needed_bytes)))


# ---------------------------- fused conv + ReLU + pool kernel ----------------------------

def _conv_relu_pool_kernel(pe_ref, po_ref, we_ref, wo_ref, be_ref, bo_ref, o_ref):
    pe = pe_ref[0]           # (CKp, Lp)  im2col patches, even output positions
    po = po_ref[0]           # (CKp, Lp)  im2col patches, odd output positions
    we = we_ref[...]         # (Cp, CKp)  even output channels
    wo = wo_ref[...]         # (Cp, CKp)  odd output channels
    be = be_ref[...]         # (Cp, 1)
    bo = bo_ref[...]         # (Cp, 1)
    # 4 corners of each 2x2 (channel, length) pooling window.
    y_ee = jnp.dot(we, pe, preferred_element_type=jnp.float32) + be
    y_oe = jnp.dot(wo, pe, preferred_element_type=jnp.float32) + bo
    y_eo = jnp.dot(we, po, preferred_element_type=jnp.float32) + be
    y_oo = jnp.dot(wo, po, preferred_element_type=jnp.float32) + bo
    y = jnp.maximum(jnp.maximum(y_ee, y_oe), jnp.maximum(y_eo, y_oo))
    # max(relu(.)) == relu(max(.)) since ReLU is monotone.
    o_ref[0] = jnp.maximum(y, 0.0).astype(o_ref.dtype)


def conv1d_relu_maxpool(x, w, b, padding):
    """Fused Conv1d + ReLU + MaxPool2d((2,2)) over (C, L).
    x: (N, Cin, L), w: (Cout, Cin, K), b: (Cout,) -> (N, Cout//2, Lout//2)."""
    N, Cin, L = x.shape
    Cout, Cin2, K = w.shape
    assert Cin == Cin2
    Lout = L + 2 * padding - K + 1
    Lp, Cp = Lout // 2, Cout // 2
    CK = Cin * K
    CKp = _round_up(CK, 128)          # pad contraction dim to the MXU lane width

    # im2col (XLA glue): patches[n, ci*K + k, j] = x_pad[n, ci, 2*j + off + k]
    # TODO(synk): at the real L=5000, replace this gather with in-kernel
    # shift-and-accumulate over K to avoid the K-fold im2col HBM inflation.
    xp = jnp.pad(x, ((0, 0), (0, 0), (padding, padding)))

    def patches(off):
        idx = (2 * jnp.arange(Lp) + off)[None, :] + jnp.arange(K)[:, None]   # (K, Lp)
        p = xp[:, :, idx].reshape(N, CK, Lp)                                 # (N, CK, Lp)
        return jnp.pad(p, ((0, 0), (0, CKp - CK), (0, 0)))

    def wmat(off):
        m = w[off::2].reshape(Cp, CK)
        return jnp.pad(m, ((0, 0), (0, CKp - CK)))

    pe, po = patches(0), patches(1)
    we, wo = wmat(0), wmat(1)
    be, bo = b[0::2].reshape(Cp, 1), b[1::2].reshape(Cp, 1)

    needed = 4 * (2 * 2 * CKp * Lp        # double-buffered even/odd patch tiles
                  + 2 * (Cp * CKp + Cp)   # weights + biases
                  + 2 * Cp * Lp)          # double-buffered output tile
    vlim = _vmem_limit_bytes(needed)

    patch_spec = pl.BlockSpec((1, CKp, Lp), lambda n: (n, 0, 0))
    w_spec = pl.BlockSpec((Cp, CKp), lambda n: (0, 0))
    b_spec = pl.BlockSpec((Cp, 1), lambda n: (0, 0))

    # Grid over batch, "parallel" so v7x can shard the two samples across its 2 TCs.
    # (At the real L=5000 one would additionally tile the Lp lane axis.)
    return pl.pallas_call(
        _conv_relu_pool_kernel,
        out_shape=jax.ShapeDtypeStruct((N, Cp, Lp), jnp.float32),
        grid=(N,),
        in_specs=[patch_spec, patch_spec, w_spec, w_spec, b_spec, b_spec],
        out_specs=pl.BlockSpec((1, Cp, Lp), lambda n: (n, 0, 0)),
        compiler_params=pltpu.CompilerParams(
            dimension_semantics=("parallel",),
            vmem_limit_bytes=vlim),
    )(pe, po, we, wo, be, bo)


# ---------------------------- fused dense1+dense2+out+logsoftmax kernel ----------------------------

def _dense_tail_kernel(h_ref, w1_ref, b1_ref, w2_ref, b2_ref, w3_ref, b3_ref,
                       out_ref, logits_ref, acc_ref):
    k = pl.program_id(0)

    @pl.when(k == 0)
    def _():
        acc_ref[...] = jnp.zeros_like(acc_ref)

    # dense1, K-tiled accumulation in f32.
    acc_ref[...] += jnp.dot(h_ref[...], w1_ref[...], preferred_element_type=jnp.float32)

    @pl.when(k == pl.num_programs(0) - 1)
    def _():
        h1 = acc_ref[...] + b1_ref[...]                       # (M, 128)
        # TODO(synk): drop1/drop2 (nn.Dropout p=0.3) are eval-mode identity here.
        h2 = jnp.dot(h1, w2_ref[...], preferred_element_type=jnp.float32) + b2_ref[...]
        logits = jnp.dot(h2, w3_ref[...], preferred_element_type=jnp.float32) + b3_ref[...]
        logits_ref[...] = logits.astype(logits_ref.dtype)
        m = jnp.max(logits, axis=-1, keepdims=True)
        s = logits - m
        lse = jnp.log(jnp.sum(jnp.exp(s), axis=-1, keepdims=True))
        out_ref[...] = (s - lse).astype(out_ref.dtype)


def dense_tail(h, w1, b1, w2, b2, w3, b3, *, max_tk=2048):
    """Fused dense1 -> dense2 -> out -> log_softmax.
    h: (M, F); w1: (F, 128); w2: (128, 50); w3: (50, 10) (weights stored pre-transposed).
    max_tk ~ 2048 for v5e/v6e; ~1024 is a better default on v7x (64 MiB VMEM)."""
    M, F = h.shape
    F2, H1 = w1.shape
    assert F == F2
    H2 = w2.shape[1]
    C = w3.shape[1]

    tk = min(max_tk, _round_up(F, 128))
    F_pad = _round_up(F, tk)
    if F_pad != F:
        h = jnp.pad(h, ((0, 0), (0, F_pad - F)))
        w1 = jnp.pad(w1, ((0, F_pad - F), (0, 0)))
    n_k = F_pad // tk

    needed = 4 * (2 * (M * tk + tk * H1)                # double-buffered K tiles
                  + H1 + H1 * H2 + H2 + H2 * C + C     # small weights/biases
                  + M * H1                             # accumulator scratch
                  + 4 * M * C)                         # outputs
    vlim = _vmem_limit_bytes(needed)

    out, logits = pl.pallas_call(
        _dense_tail_kernel,
        out_shape=(jax.ShapeDtypeStruct((M, C), jnp.float32),
                   jax.ShapeDtypeStruct((M, C), jnp.float32)),
        grid=(n_k,),
        in_specs=[
            pl.BlockSpec((M, tk), lambda k: (0, k)),
            pl.BlockSpec((tk, H1), lambda k: (k, 0)),
            pl.BlockSpec((1, H1), lambda k: (0, 0)),
            pl.BlockSpec((H1, H2), lambda k: (0, 0)),
            pl.BlockSpec((1, H2), lambda k: (0, 0)),
            pl.BlockSpec((H2, C), lambda k: (0, 0)),
            pl.BlockSpec((1, C), lambda k: (0, 0)),
        ],
        out_specs=(pl.BlockSpec((M, C), lambda k: (0, 0)),
                   pl.BlockSpec((M, C), lambda k: (0, 0))),
        scratch_shapes=[pltpu.VMEM((M, H1), jnp.float32)],
        compiler_params=pltpu.CompilerParams(
            dimension_semantics=("arbitrary",),
            vmem_limit_bytes=vlim),
    )(h, w1, b1.reshape(1, H1), w2, b2.reshape(1, H2), w3, b3.reshape(1, C))
    return out, logits


# ---------------------------- params & forward ----------------------------

def init_params(key, flat_features):
    """PyTorch-style uniform(-1/sqrt(fan_in), 1/sqrt(fan_in)) init.
    Dense weights are stored pre-transposed as (in_features, out_features)."""
    def uniform(k, shape, fan_in):
        bound = 1.0 / float(fan_in) ** 0.5
        return jax.random.uniform(k, shape, jnp.float32, -bound, bound)

    ks = jax.random.split(key, 10)
    return {
        # conv1: Conv1d(8 -> 60, kernel=15, padding=2)
        "w1": uniform(ks[0], (60, 8, 15), 8 * 15),
        "b1": uniform(ks[1], (60,), 8 * 15),
        # conv2: Conv1d(30 -> 60, kernel=3, padding=2)
        "w2": uniform(ks[2], (60, 30, 3), 30 * 3),
        "b2": uniform(ks[3], (60,), 30 * 3),
        # dense1: Linear(flat_features, 128)  (37440 in the original, L=5000)
        "wd1": uniform(ks[4], (flat_features, 128), flat_features),
        "bd1": uniform(ks[5], (128,), flat_features),
        # dense2: Linear(128, 50)
        "wd2": uniform(ks[6], (128, 50), 128),
        "bd2": uniform(ks[7], (50,), 128),
        # out: Linear(50, 10)
        "wo": uniform(ks[8], (50, 10), 50),
        "bo": uniform(ks[9], (10,), 50),
    }


def cnn_forward(params, x):
    # conv1 block: Conv1d(8->60, k=15, p=2) -> ReLU -> MaxPool2d((2,2)) over (C, L)
    h = conv1d_relu_maxpool(x, params["w1"], params["b1"], padding=2)   # (N, 30, L1)
    # conv2 block: Conv1d(30->60, k=3, p=2) -> ReLU -> MaxPool2d((2,2)) over (C, L)
    h = conv1d_relu_maxpool(h, params["w2"], params["b2"], padding=2)   # (N, 30, L2)
    # flatten (PyTorch x.view(N, -1) == C-order reshape)
    h = h.reshape(h.shape[0], -1)
    # fused dense1 -> drop1 -> dense2 -> drop2 -> out -> log_softmax
    output, logits = dense_tail(h, params["wd1"], params["bd1"],
                                params["wd2"], params["bd2"],
                                params["wo"], params["bo"])
    return output, logits


# ---------------------------- plain-JAX reference (for the self-check) ----------------------------

def _reference_forward(params, x):
    def conv1d(x, w, b, padding):
        y = jax.lax.conv_general_dilated(
            x, w, window_strides=(1,), padding=[(padding, padding)],
            dimension_numbers=("NCH", "OIH", "NCH"))
        return y + b[None, :, None]

    def pool_cl(x):
        n, c, l = x.shape
        cp, lp = c // 2, l // 2
        return x[:, :2 * cp, :2 * lp].reshape(n, cp, 2, lp, 2).max(axis=(2, 4))

    h = pool_cl(jax.nn.relu(conv1d(x, params["w1"], params["b1"], 2)))
    h = pool_cl(jax.nn.relu(conv1d(h, params["w2"], params["b2"], 2)))
    h = h.reshape(h.shape[0], -1)
    h = h @ params["wd1"] + params["bd1"]
    h = h @ params["wd2"] + params["bd2"]
    logits = h @ params["wo"] + params["bo"]
    return jax.nn.log_softmax(logits, axis=-1), logits


# ---------------------------- self-test ----------------------------

if __name__ == "__main__":
    # Small shapes: batch=2, in_channels=8, length=64.
    # (The original module implies length=5000, giving the 37440-wide dense1.)
    N, Cin, L = 2, 8, 64
    x = jax.random.normal(jax.random.PRNGKey(0), (N, Cin, L), jnp.float32)

    # Derive the flatten size from the architecture for the chosen L.
    L1 = (L + 2 * 2 - 15 + 1) // 2        # length after conv1 + pool
    L2 = (L1 + 2 * 2 - 3 + 1) // 2        # length after conv2 + pool
    flat_features = 30 * L2               # channels pooled 60 -> 30

    params = init_params(jax.random.PRNGKey(1), flat_features)

    fwd = jax.jit(cnn_forward)
    output, logits = fwd(params, x)
    jax.block_until_ready((output, logits))

    assert output.shape == (N, 10) and logits.shape == (N, 10)
    assert output.dtype == jnp.float32 and logits.dtype == jnp.float32

    # Correctness check against a plain-JAX reference forward.
    with jax.default_matmul_precision("float32"):
        ref_output, ref_logits = _reference_forward(params, x)
    assert jnp.allclose(logits, ref_logits, atol=5e-2, rtol=5e-2), \
        float(jnp.max(jnp.abs(logits - ref_logits)))
    assert jnp.allclose(output, ref_output, atol=5e-2, rtol=5e-2)
    assert jnp.allclose(jnp.sum(jnp.exp(output), axis=1), 1.0, atol=1e-3)

    print("KERNEL_OK")
</pallas_src>

<mosaic_0001>
module attributes {stable_mosaic.version = 11 : i64} {
  func.func @_conv_relu_pool_kernel(%arg0: i32, %arg1: memref<1x128x27xf32, #tpu.memory_space<vmem>>, %arg2: memref<1x128x27xf32, #tpu.memory_space<vmem>>, %arg3: memref<30x128xf32, #tpu.memory_space<vmem>>, %arg4: memref<30x128xf32, #tpu.memory_space<vmem>>, %arg5: memref<30x1xf32, #tpu.memory_space<vmem>>, %arg6: memref<30x1xf32, #tpu.memory_space<vmem>>, %arg7: memref<1x30x27xf32, #tpu.memory_space<vmem>>) attributes {dimension_semantics = [#tpu.dimension_semantics<parallel>], iteration_bounds = array<i64: 2>, scalar_prefetch = 0 : i64, scratch_operands = 0 : i64, tpu.core_type = #tpu.core_type<tc>, window_params = [{transform_indices = @transform_0, window_bounds = array<i64: 1, 128, 27>}, {transform_indices = @transform_1, window_bounds = array<i64: 1, 128, 27>}, {pipeline_mode = #tpu.pipeline_mode<synchronous>, transform_indices = @transform_2, window_bounds = array<i64: 30, 128>}, {pipeline_mode = #tpu.pipeline_mode<synchronous>, transform_indices = @transform_3, window_bounds = array<i64: 30, 128>}, {pipeline_mode = #tpu.pipeline_mode<synchronous>, transform_indices = @transform_4, window_bounds = array<i64: 30, 1>}, {pipeline_mode = #tpu.pipeline_mode<synchronous>, transform_indices = @transform_5, window_bounds = array<i64: 30, 1>}, {transform_indices = @transform_6, window_bounds = array<i64: 1, 30, 27>}]} {
    %c0 = arith.constant 0 : index
    %c0_0 = arith.constant 0 : index
    %c0_1 = arith.constant 0 : index
    %0 = vector.load %arg1[%c0, %c0_0, %c0_1] : memref<1x128x27xf32, #tpu.memory_space<vmem>>, vector<1x128x27xf32>
    %1 = vector.shape_cast %0 : vector<1x128x27xf32> to vector<128x27xf32>
    %c0_2 = arith.constant 0 : index
    %c0_3 = arith.constant 0 : index
    %c0_4 = arith.constant 0 : index
    %2 = vector.load %arg2[%c0_2, %c0_3, %c0_4] : memref<1x128x27xf32, #tpu.memory_space<vmem>>, vector<1x128x27xf32>
    %3 = vector.shape_cast %2 : vector<1x128x27xf32> to vector<128x27xf32>
    %c0_5 = arith.constant 0 : index
    %c0_6 = arith.constant 0 : index
    %4 = vector.load %arg3[%c0_5, %c0_6] : memref<30x128xf32, #tpu.memory_space<vmem>>, vector<30x128xf32>
    %c0_7 = arith.constant 0 : index
    %c0_8 = arith.constant 0 : index
    %5 = vector.load %arg4[%c0_7, %c0_8] : memref<30x128xf32, #tpu.memory_space<vmem>>, vector<30x128xf32>
    %c0_9 = arith.constant 0 : index
    %c0_10 = arith.constant 0 : index
    %6 = vector.load %arg5[%c0_9, %c0_10] : memref<30x1xf32, #tpu.memory_space<vmem>>, vector<30x1xf32>
    %c0_11 = arith.constant 0 : index
    %c0_12 = arith.constant 0 : index
    %7 = vector.load %arg6[%c0_11, %c0_12] : memref<30x1xf32, #tpu.memory_space<vmem>>, vector<30x1xf32>
    %cst = arith.constant dense<0.000000e+00> : vector<30x27xf32>
    %8 = tpu.matmul %4, %1, %cst {dimension_numbers = #tpu.dot_dimension_numbers<[1], [0], [0], [1], [0, 0, 1, 1], [], []>} : vector<30x128xf32>, vector<128x27xf32>, vector<30x27xf32> -> vector<30x27xf32>
    %9 = vector.broadcast %6 : vector<30x1xf32> to vector<30x27xf32>
    %10 = arith.addf %8, %9 : vector<30x27xf32>
    %cst_13 = arith.constant dense<0.000000e+00> : vector<30x27xf32>
    %11 = tpu.matmul %5, %1, %cst_13 {dimension_numbers = #tpu.dot_dimension_numbers<[1], [0], [0], [1], [0, 0, 1, 1], [], []>} : vector<30x128xf32>, vector<128x27xf32>, vector<30x27xf32> -> vector<30x27xf32>
    %12 = vector.broadcast %7 : vector<30x1xf32> to vector<30x27xf32>
    %13 = arith.addf %11, %12 : vector<30x27xf32>
    %cst_14 = arith.constant dense<0.000000e+00> : vector<30x27xf32>
    %14 = tpu.matmul %4, %3, %cst_14 {dimension_numbers = #tpu.dot_dimension_numbers<[1], [0], [0], [1], [0, 0, 1, 1], [], []>} : vector<30x128xf32>, vector<128x27xf32>, vector<30x27xf32> -> vector<30x27xf32>
    %15 = vector.broadcast %6 : vector<30x1xf32> to vector<30x27xf32>
    %16 = arith.addf %14, %15 : vector<30x27xf32>
    %cst_15 = arith.constant dense<0.000000e+00> : vector<30x27xf32>
    %17 = tpu.matmul %5, %3, %cst_15 {dimension_numbers = #tpu.dot_dimension_numbers<[1], [0], [0], [1], [0, 0, 1, 1], [], []>} : vector<30x128xf32>, vector<128x27xf32>, vector<30x27xf32> -> vector<30x27xf32>
    %18 = vector.broadcast %7 : vector<30x1xf32> to vector<30x27xf32>
    %19 = arith.addf %17, %18 : vector<30x27xf32>
    %20 = arith.maximumf %10, %13 : vector<30x27xf32>
    %21 = arith.maximumf %16, %19 : vector<30x27xf32>
    %22 = arith.maximumf %20, %21 : vector<30x27xf32>
    %cst_16 = arith.constant 0.000000e+00 : f32
    %23 = vector.broadcast %cst_16 : f32 to vector<30x27xf32>
    %24 = arith.maximumf %22, %23 : vector<30x27xf32>
    %c0_17 = arith.constant 0 : index
    %c0_18 = arith.constant 0 : index
    %c0_19 = arith.constant 0 : index
    %25 = vector.load %arg7[%c0_17, %c0_18, %c0_19] : memref<1x30x27xf32, #tpu.memory_space<vmem>>, vector<1x30x27xf32>
    %26 = vector.shape_cast %25 : vector<1x30x27xf32> to vector<30x27xf32>
    %27 = vector.shape_cast %24 : vector<30x27xf32> to vector<1x30x27xf32>
    tpu.vector_store %arg7[%c0_17, %c0_18, %c0_19], %27 {strides = array<i32>} : memref<1x30x27xf32, #tpu.memory_space<vmem>>, vector<1x30x27xf32>,
    return
  }
  func.func @transform_0(%arg0: i32) -> (i32, i32, i32) {
    %c0_i32 = arith.constant 0 : i32
    %c0_i32_0 = arith.constant 0 : i32
    %c0_i32_1 = arith.constant 0 : i32
    return %arg0, %c0_i32, %c0_i32_0 : i32, i32, i32
  }
  func.func @transform_1(%arg0: i32) -> (i32, i32, i32) {
    %c0_i32 = arith.constant 0 : i32
    %c0_i32_0 = arith.constant 0 : i32
    %c0_i32_1 = arith.constant 0 : i32
    return %arg0, %c0_i32, %c0_i32_0 : i32, i32, i32
  }
  func.func @transform_2(%arg0: i32) -> (i32, i32) {
    %c0_i32 = arith.constant 0 : i32
    %c0_i32_0 = arith.constant 0 : i32
    %c0_i32_1 = arith.constant 0 : i32
    return %c0_i32, %c0_i32_0 : i32, i32
  }
  func.func @transform_3(%arg0: i32) -> (i32, i32) {
    %c0_i32 = arith.constant 0 : i32
    %c0_i32_0 = arith.constant 0 : i32
    %c0_i32_1 = arith.constant 0 : i32
    return %c0_i32, %c0_i32_0 : i32, i32
  }
  func.func @transform_4(%arg0: i32) -> (i32, i32) {
    %c0_i32 = arith.constant 0 : i32
    %c0_i32_0 = arith.constant 0 : i32
    %c0_i32_1 = arith.constant 0 : i32
    return %c0_i32, %c0_i32_0 : i32, i32
  }
  func.func @transform_5(%arg0: i32) -> (i32, i32) {
    %c0_i32 = arith.constant 0 : i32
    %c0_i32_0 = arith.constant 0 : i32
    %c0_i32_1 = arith.constant 0 : i32
    return %c0_i32, %c0_i32_0 : i32, i32
  }
  func.func @transform_6(%arg0: i32) -> (i32, i32, i32) {
    %c0_i32 = arith.constant 0 : i32
    %c0_i32_0 = arith.constant 0 : i32
    %c0_i32_1 = arith.constant 0 : i32
    return %arg0, %c0_i32, %c0_i32_0 : i32, i32, i32
  }
}

module attributes {stable_mosaic.version = 11 : i64} {
  func.func @_conv_relu_pool_kernel(%arg0: i32, %arg1: memref<1x128x14xf32, #tpu.memory_space<vmem>>, %arg2: memref<1x128x14xf32, #tpu.memory_space<vmem>>, %arg3: memref<30x128xf32, #tpu.memory_space<vmem>>, %arg4: memref<30x128xf32, #tpu.memory_space<vmem>>, %arg5: memref<30x1xf32, #tpu.memory_space<vmem>>, %arg6: memref<30x1xf32, #tpu.memory_space<vmem>>, %arg7: memref<1x30x14xf32, #tpu.memory_space<vmem>>) attributes {dimension_semantics = [#tpu.dimension_semantics<parallel>], iteration_bounds = array<i64: 2>, scalar_prefetch = 0 : i64, scratch_operands = 0 : i64, tpu.core_type = #tpu.core_type<tc>, window_params = [{transform_indices = @transform_0, window_bounds = array<i64: 1, 128, 14>}, {transform_indices = @transform_1, window_bounds = array<i64: 1, 128, 14>}, {pipeline_mode = #tpu.pipeline_mode<synchronous>, transform_indices = @transform_2, window_bounds = array<i64: 30, 128>}, {pipeline_mode = #tpu.pipeline_mode<synchronous>, transform_indices = @transform_3, window_bounds = array<i64: 30, 128>}, {pipeline_mode = #tpu.pipeline_mode<synchronous>, transform_indices = @transform_4, window_bounds = array<i64: 30, 1>}, {pipeline_mode = #tpu.pipeline_mode<synchronous>, transform_indices = @transform_5, window_bounds = array<i64: 30, 1>}, {transform_indices = @transform_6, window_bounds = array<i64: 1, 30, 14>}]} {
    %c0 = arith.constant 0 : index
    %c0_0 = arith.constant 0 : index
    %c0_1 = arith.constant 0 : index
    %0 = vector.load %arg1[%c0, %c0_0, %c0_1] : memref<1x128x14xf32, #tpu.memory_space<vmem>>, vector<1x128x14xf32>
    %1 = vector.shape_cast %0 : vector<1x128x14xf32> to vector<128x14xf32>
    %c0_2 = arith.constant 0 : index
    %c0_3 = arith.constant 0 : index
    %c0_4 = arith.constant 0 : index
    %2 = vector.load %arg2[%c0_2, %c0_3, %c0_4] : memref<1x128x14xf32, #tpu.memory_space<vmem>>, vector<1x128x14xf32>
    %3 = vector.shape_cast %2 : vector<1x128x14xf32> to vector<128x14xf32>
    %c0_5 = arith.constant 0 : index
    %c0_6 = arith.constant 0 : index
    %4 = vector.load %arg3[%c0_5, %c0_6] : memref<30x128xf32, #tpu.memory_space<vmem>>, vector<30x128xf32>
    %c0_7 = arith.constant 0 : index
    %c0_8 = arith.constant 0 : index
    %5 = vector.load %arg4[%c0_7, %c0_8] : memref<30x128xf32, #tpu.memory_space<vmem>>, vector<30x128xf32>
    %c0_9 = arith.constant 0 : index
    %c0_10 = arith.constant 0 : index
    %6 = vector.load %arg5[%c0_9, %c0_10] : memref<30x1xf32, #tpu.memory_space<vmem>>, vector<30x1xf32>
    %c0_11 = arith.constant 0 : index
    %c0_12 = arith.constant 0 : index
    %7 = vector.load %arg6[%c0_11, %c0_12] : memref<30x1xf32, #tpu.memory_space<vmem>>, vector<30x1xf32>
    %cst = arith.constant dense<0.000000e+00> : vector<30x14xf32>
    %8 = tpu.matmul %4, %1, %cst {dimension_numbers = #tpu.dot_dimension_numbers<[1], [0], [0], [1], [0, 0, 1, 1], [], []>} : vector<30x128xf32>, vector<128x14xf32>, vector<30x14xf32> -> vector<30x14xf32>
    %9 = vector.broadcast %6 : vector<30x1xf32> to vector<30x14xf32>
    %10 = arith.addf %8, %9 : vector<30x14xf32>
    %cst_13 = arith.constant dense<0.000000e+00> : vector<30x14xf32>
    %11 = tpu.matmul %5, %1, %cst_13 {dimension_numbers = #tpu.dot_dimension_numbers<[1], [0], [0], [1], [0, 0, 1, 1], [], []>} : vector<30x128xf32>, vector<128x14xf32>, vector<30x14xf32> -> vector<30x14xf32>
    %12 = vector.broadcast %7 : vector<30x1xf32> to vector<30x14xf32>
    %13 = arith.addf %11, %12 : vector<30x14xf32>
    %cst_14 = arith.constant dense<0.000000e+00> : vector<30x14xf32>
    %14 = tpu.matmul %4, %3, %cst_14 {dimension_numbers = #tpu.dot_dimension_numbers<[1], [0], [0], [1], [0, 0, 1, 1], [], []>} : vector<30x128xf32>, vector<128x14xf32>, vector<30x14xf32> -> vector<30x14xf32>
    %15 = vector.broadcast %6 : vector<30x1xf32> to vector<30x14xf32>
    %16 = arith.addf %14, %15 : vector<30x14xf32>
    %cst_15 = arith.constant dense<0.000000e+00> : vector<30x14xf32>
    %17 = tpu.matmul %5, %3, %cst_15 {dimension_numbers = #tpu.dot_dimension_numbers<[1], [0], [0], [1], [0, 0, 1, 1], [], []>} : vector<30x128xf32>, vector<128x14xf32>, vector<30x14xf32> -> vector<30x14xf32>
    %18 = vector.broadcast %7 : vector<30x1xf32> to vector<30x14xf32>
    %19 = arith.addf %17, %18 : vector<30x14xf32>
    %20 = arith.maximumf %10, %13 : vector<30x14xf32>
    %21 = arith.maximumf %16, %19 : vector<30x14xf32>
    %22 = arith.maximumf %20, %21 : vector<30x14xf32>
    %cst_16 = arith.constant 0.000000e+00 : f32
    %23 = vector.broadcast %cst_16 : f32 to vector<30x14xf32>
    %24 = arith.maximumf %22, %23 : vector<30x14xf32>
    %c0_17 = arith.constant 0 : index
    %c0_18 = arith.constant 0 : index
    %c0_19 = arith.constant 0 : index
    %25 = vector.load %arg7[%c0_17, %c0_18, %c0_19] : memref<1x30x14xf32, #tpu.memory_space<vmem>>, vector<1x30x14xf32>
    %26 = vector.shape_cast %25 : vector<1x30x14xf32> to vector<30x14xf32>
    %27 = vector.shape_cast %24 : vector<30x14xf32> to vector<1x30x14xf32>
    tpu.vector_store %arg7[%c0_17, %c0_18, %c0_19], %27 {strides = array<i32>} : memref<1x30x14xf32, #tpu.memory_space<vmem>>, vector<1x30x14xf32>,
    return
  }
  func.func @transform_0(%arg0: i32) -> (i32, i32, i32) {
    %c0_i32 = arith.constant 0 : i32
    %c0_i32_0 = arith.constant 0 : i32
    %c0_i32_1 = arith.constant 0 : i32
    return %arg0, %c0_i32, %c0_i32_0 : i32, i32, i32
  }
  func.func @transform_1(%arg0: i32) -> (i32, i32, i32) {
    %c0_i32 = arith.constant 0 : i32
    %c0_i32_0 = arith.constant 0 : i32
    %c0_i32_1 = arith.constant 0 : i32
    return %arg0, %c0_i32, %c0_i32_0 : i32, i32, i32
  }
  func.func @transform_2(%arg0: i32) -> (i32, i32) {
    %c0_i32 = arith.constant 0 : i32
    %c0_i32_0 = arith.constant 0 : i32
    %c0_i32_1 = arith.constant 0 : i32
    return %c0_i32, %c0_i32_0 : i32, i32
  }
  func.func @transform_3(%arg0: i32) -> (i32, i32) {
    %c0_i32 = arith.constant 0 : i32
    %c0_i32_0 = arith.constant 0 : i32
    %c0_i32_1 = arith.constant 0 : i32
    return %c0_i32, %c0_i32_0 : i32, i32
  }
  func.func @transform_4(%arg0: i32) -> (i32, i32) {
    %c0_i32 = arith.constant 0 : i32
    %c0_i32_0 = arith.constant 0 : i32
    %c0_i32_1 = arith.constant 0 : i32
    return %c0_i32, %c0_i32_0 : i32, i32
  }
  func.func @transform_5(%arg0: i32) -> (i32, i32) {
    %c0_i32 = arith.constant 0 : i32
    %c0_i32_0 = arith.constant 0 : i32
    %c0_i32_1 = arith.constant 0 : i32
    return %c0_i32, %c0_i32_0 : i32, i32
  }
  func.func @transform_6(%arg0: i32) -> (i32, i32, i32) {
    %c0_i32 = arith.constant 0 : i32
    %c0_i32_0 = arith.constant 0 : i32
    %c0_i32_1 = arith.constant 0 : i32
    return %arg0, %c0_i32, %c0_i32_0 : i32, i32, i32
  }
}

module attributes {stable_mosaic.version = 11 : i64} {
  func.func @_dense_tail_kernel(%arg0: i32, %arg1: memref<2x512xf32, #tpu.memory_space<vmem>>, %arg2: memref<512x128xf32, #tpu.memory_space<vmem>>, %arg3: memref<1x128xf32, #tpu.memory_space<vmem>>, %arg4: memref<128x50xf32, #tpu.memory_space<vmem>>, %arg5: memref<1x50xf32, #tpu.memory_space<vmem>>, %arg6: memref<50x10xf32, #tpu.memory_space<vmem>>, %arg7: memref<1x10xf32, #tpu.memory_space<vmem>>, %arg8: memref<2x10xf32, #tpu.memory_space<vmem>>, %arg9: memref<2x10xf32, #tpu.memory_space<vmem>>, %arg10: memref<2x128xf32, #tpu.memory_space<vmem>>) attributes {dimension_semantics = [#tpu.dimension_semantics<arbitrary>], iteration_bounds = array<i64: 1>, scalar_prefetch = 0 : i64, scratch_operands = 1 : i64, tpu.core_type = #tpu.core_type<tc>, window_params = [{transform_indices = @transform_0, window_bounds = array<i64: 2, 512>}, {transform_indices = @transform_1, window_bounds = array<i64: 512, 128>}, {pipeline_mode = #tpu.pipeline_mode<synchronous>, transform_indices = @transform_2, window_bounds = array<i64: 1, 128>}, {pipeline_mode = #tpu.pipeline_mode<synchronous>, transform_indices = @transform_3, window_bounds = array<i64: 128, 50>}, {pipeline_mode = #tpu.pipeline_mode<synchronous>, transform_indices = @transform_4, window_bounds = array<i64: 1, 50>}, {pipeline_mode = #tpu.pipeline_mode<synchronous>, transform_indices = @transform_5, window_bounds = array<i64: 50, 10>}, {pipeline_mode = #tpu.pipeline_mode<synchronous>, transform_indices = @transform_6, window_bounds = array<i64: 1, 10>}, {pipeline_mode = #tpu.pipeline_mode<synchronous>, transform_indices = @transform_7, window_bounds = array<i64: 2, 10>}, {pipeline_mode = #tpu.pipeline_mode<synchronous>, transform_indices = @transform_8, window_bounds = array<i64: 2, 10>}]} {
    %c0_i32 = arith.constant 0 : i32
    %0 = arith.cmpi eq, %arg0, %c0_i32 : i32
    %1 = arith.extui %0 : i1 to i32
    %c0_i32_0 = arith.constant 0 : i32
    %2 = arith.cmpi ne, %1, %c0_i32_0 : i32
    scf.if %2 {
      %cst_10 = arith.constant 0.000000e+00 : f32
      %12 = vector.broadcast %cst_10 : f32 to vector<2x128xf32>
      %c0_11 = arith.constant 0 : index
      %c0_12 = arith.constant 0 : index
      %13 = vector.load %arg10[%c0_11, %c0_12] : memref<2x128xf32, #tpu.memory_space<vmem>>, vector<2x128xf32>
      tpu.vector_store %arg10[%c0_11, %c0_12], %12 {strides = array<i32>} : memref<2x128xf32, #tpu.memory_space<vmem>>, vector<2x128xf32>,
    } else {
    }
    %c0 = arith.constant 0 : index
    %c0_1 = arith.constant 0 : index
    %3 = vector.load %arg10[%c0, %c0_1] : memref<2x128xf32, #tpu.memory_space<vmem>>, vector<2x128xf32>
    %c0_2 = arith.constant 0 : index
    %c0_3 = arith.constant 0 : index
    %4 = vector.load %arg1[%c0_2, %c0_3] : memref<2x512xf32, #tpu.memory_space<vmem>>, vector<2x512xf32>
    %c0_4 = arith.constant 0 : index
    %c0_5 = arith.constant 0 : index
    %5 = vector.load %arg2[%c0_4, %c0_5] : memref<512x128xf32, #tpu.memory_space<vmem>>, vector<512x128xf32>
    %cst = arith.constant dense<0.000000e+00> : vector<2x128xf32>
    %6 = tpu.matmul %4, %5, %cst {dimension_numbers = #tpu.dot_dimension_numbers<[1], [0], [0], [1], [0, 0, 1, 1], [], []>} : vector<2x512xf32>, vector<512x128xf32>, vector<2x128xf32> -> vector<2x128xf32>
    %7 = arith.addf %3, %6 : vector<2x128xf32>
    %c0_6 = arith.constant 0 : index
    %c0_7 = arith.constant 0 : index
    %8 = vector.load %arg10[%c0_6, %c0_7] : memref<2x128xf32, #tpu.memory_space<vmem>>, vector<2x128xf32>
    tpu.vector_store %arg10[%c0_6, %c0_7], %7 {strides = array<i32>} : memref<2x128xf32, #tpu.memory_space<vmem>>, vector<2x128xf32>,
    %c0_i32_8 = arith.constant 0 : i32
    %9 = arith.cmpi eq, %arg0, %c0_i32_8 : i32
    %10 = arith.extui %9 : i1 to i32
    %c0_i32_9 = arith.constant 0 : i32
    %11 = arith.cmpi ne, %10, %c0_i32_9 : i32
    scf.if %11 {
      %c0_10 = arith.constant 0 : index
      %c0_11 = arith.constant 0 : index
      %12 = vector.load %arg10[%c0_10, %c0_11] : memref<2x128xf32, #tpu.memory_space<vmem>>, vector<2x128xf32>
      %c0_12 = arith.constant 0 : index
      %c0_13 = arith.constant 0 : index
      %13 = vector.load %arg3[%c0_12, %c0_13] : memref<1x128xf32, #tpu.memory_space<vmem>>, vector<1x128xf32>
      %14 = vector.broadcast %13 : vector<1x128xf32> to vector<2x128xf32>
      %15 = arith.addf %12, %14 : vector<2x128xf32>
      %c0_14 = arith.constant 0 : index
      %c0_15 = arith.constant 0 : index
      %16 = vector.load %arg4[%c0_14, %c0_15] : memref<128x50xf32, #tpu.memory_space<vmem>>, vector<128x50xf32>
      %cst_16 = arith.constant dense<0.000000e+00> : vector<2x50xf32>
      %17 = tpu.matmul %15, %16, %cst_16 {dimension_numbers = #tpu.dot_dimension_numbers<[1], [0], [0], [1], [0, 0, 1, 1], [], []>} : vector<2x128xf32>, vector<128x50xf32>, vector<2x50xf32> -> vector<2x50xf32>
      %c0_17 = arith.constant 0 : index
      %c0_18 = arith.constant 0 : index
      %18 = vector.load %arg5[%c0_17, %c0_18] : memref<1x50xf32, #tpu.memory_space<vmem>>, vector<1x50xf32>
      %19 = vector.broadcast %18 : vector<1x50xf32> to vector<2x50xf32>
      %20 = arith.addf %17, %19 : vector<2x50xf32>
      %c0_19 = arith.constant 0 : index
      %c0_20 = arith.constant 0 : index
      %21 = vector.load %arg6[%c0_19, %c0_20] : memref<50x10xf32, #tpu.memory_space<vmem>>, vector<50x10xf32>
      %cst_21 = arith.constant dense<0.000000e+00> : vector<2x10xf32>
      %22 = tpu.matmul %20, %21, %cst_21 {dimension_numbers = #tpu.dot_dimension_numbers<[1], [0], [0], [1], [0, 0, 1, 1], [], []>} : vector<2x50xf32>, vector<50x10xf32>, vector<2x10xf32> -> vector<2x10xf32>
      %c0_22 = arith.constant 0 : index
      %c0_23 = arith.constant 0 : index
      %23 = vector.load %arg7[%c0_22, %c0_23] : memref<1x10xf32, #tpu.memory_space<vmem>>, vector<1x10xf32>
      %24 = vector.broadcast %23 : vector<1x10xf32> to vector<2x10xf32>
      %25 = arith.addf %22, %24 : vector<2x10xf32>
      %c0_24 = arith.constant 0 : index
      %c0_25 = arith.constant 0 : index
      %26 = vector.load %arg9[%c0_24, %c0_25] : memref<2x10xf32, #tpu.memory_space<vmem>>, vector<2x10xf32>
      tpu.vector_store %arg9[%c0_24, %c0_25], %25 {strides = array<i32>} : memref<2x10xf32, #tpu.memory_space<vmem>>, vector<2x10xf32>,
      %cst_26 = arith.constant dense<0xFF800000> : vector<2xf32>
      %27 = vector.multi_reduction <maximumf>, %25, %cst_26 [1] : vector<2x10xf32> to vector<2xf32>
      %28 = vector.shape_cast %27 : vector<2xf32> to vector<2x1xf32>
      %29 = vector.broadcast %28 : vector<2x1xf32> to vector<2x10xf32>
      %30 = arith.subf %25, %29 : vector<2x10xf32>
      %31 = math.exp %30 : vector<2x10xf32>
      %cst_27 = arith.constant dense<0.000000e+00> : vector<2xf32>
      %32 = vector.multi_reduction <add>, %31, %cst_27 [1] : vector<2x10xf32> to vector<2xf32>
      %33 = vector.shape_cast %32 : vector<2xf32> to vector<2x1xf32>
      %34 = math.log %33 : vector<2x1xf32>
      %35 = vector.broadcast %34 : vector<2x1xf32> to vector<2x10xf32>
      %36 = arith.subf %30, %35 : vector<2x10xf32>
      %c0_28 = arith.constant 0 : index
      %c0_29 = arith.constant 0 : index
      %37 = vector.load %arg8[%c0_28, %c0_29] : memref<2x10xf32, #tpu.memory_space<vmem>>, vector<2x10xf32>
      tpu.vector_store %arg8[%c0_28, %c0_29], %36 {strides = array<i32>} : memref<2x10xf32, #tpu.memory_space<vmem>>, vector<2x10xf32>,
    } else {
    }
    return
  }
  func.func @transform_0(%arg0: i32) -> (i32, i32) {
    %c0_i32 = arith.constant 0 : i32
    %c0_i32_0 = arith.constant 0 : i32
    return %c0_i32, %arg0 : i32, i32
  }
  func.func @transform_1(%arg0: i32) -> (i32, i32) {
    %c0_i32 = arith.constant 0 : i32
    %c0_i32_0 = arith.constant 0 : i32
    return %arg0, %c0_i32 : i32, i32
  }
  func.func @transform_2(%arg0: i32) -> (i32, i32) {
    %c0_i32 = arith.constant 0 : i32
    %c0_i32_0 = arith.constant 0 : i32
    %c0_i32_1 = arith.constant 0 : i32
    return %c0_i32, %c0_i32_0 : i32, i32
  }
  func.func @transform_3(%arg0: i32) -> (i32, i32) {
    %c0_i32 = arith.constant 0 : i32
    %c0_i32_0 = arith.constant 0 : i32
    %c0_i32_1 = arith.constant 0 : i32
    return %c0_i32, %c0_i32_0 : i32, i32
  }
  func.func @transform_4(%arg0: i32) -> (i32, i32) {
    %c0_i32 = arith.constant 0 : i32
    %c0_i32_0 = arith.constant 0 : i32
    %c0_i32_1 = arith.constant 0 : i32
    return %c0_i32, %c0_i32_0 : i32, i32
  }
  func.func @transform_5(%arg0: i32) -> (i32, i32) {
    %c0_i32 = arith.constant 0 : i32
    %c0_i32_0 = arith.constant 0 : i32
    %c0_i32_1 = arith.constant 0 : i32
    return %c0_i32, %c0_i32_0 : i32, i32
  }
  func.func @transform_6(%arg0: i32) -> (i32, i32) {
    %c0_i32 = arith.constant 0 : i32
    %c0_i32_0 = arith.constant 0 : i32
    %c0_i32_1 = arith.constant 0 : i32
    return %c0_i32, %c0_i32_0 : i32, i32
  }
  func.func @transform_7(%arg0: i32) -> (i32, i32) {
    %c0_i32 = arith.constant 0 : i32
    %c0_i32_0 = arith.constant 0 : i32
    %c0_i32_1 = arith.constant 0 : i32
    return %c0_i32, %c0_i32_0 : i32, i32
  }
  func.func @transform_8(%arg0: i32) -> (i32, i32) {
    %c0_i32 = arith.constant 0 : i32
    %c0_i32_0 = arith.constant 0 : i32
    %c0_i32_1 = arith.constant 0 : i32
    return %c0_i32, %c0_i32_0 : i32, i32
  }
}

</mosaic_0001>

<bundles_post_ra>
// kernel: cnn_forward.3
= control target key start
LH: loop header
LB: loop body
LE: loop exit
PB: predicated region body
PF: predicated region fallthrough
CT: control target
= control target key end

     0   :  { %s1220_s21 = smov 0   ;;  %s1351_s0 = inlined_call_operand.vmem [shape: f32[2,128,27], index: 0, kind: input, shape index: {}]   ;;  %s1352_s1 = inlined_call_operand.vmem [shape: f32[2,128,27], index: 1, kind: input, shape index: {}]   ;;  %s1353_s2 = inlined_call_operand.vmem [shape: f32[30,128], index: 2, kind: input, shape index: {}]   ;;  %s1354_s3 = inlined_call_operand.vmem [shape: f32[30,128], index: 3, kind: input, shape index: {}]   ;;  %s1355_s4 = inlined_call_operand.vmem [shape: f32[30,1], index: 4, kind: input, shape index: {}]   ;;  %s1356_s5 = inlined_call_operand.vmem [shape: f32[30,1], index: 5, kind: input, shape index: {}]   ;;  %s1357_s6 = inlined_call_operand.vmem [shape: f32[2,30,27], index: 6, kind: output, shape index: {}]  }
   0x1 LB: > { %s789_s22 = sadd.s32 4294967295, %s1182_s21   ;;  %p793_p0 = scmp.ge.s32.totalorder %s1182_s21, 1  ;;  %s1182_s21 = sphi %s1220_s21, %s16_s21  }
   0x2   : > { %p222_p1 = scmp.lt.s32.totalorder %s1182_s21, 3 }
   0x4   : > { %p223_p2 = pnand %p793_p0, %p222_p1 }
   0x5   : > { %p257_p3 = scmp.lt.s32.totalorder (!%p223_p2), %s789_s22, 1  ;;  %v1231_v0 = vld [vmem:[%s1353_s2] sm:$0xff] (!%p223_p2)  ;;  %v1184_v2 = vmov (!%p223_p2), 0   ;;  %v314_v3 = vld [vmem:[%s1355_s4 + $0x10] sm:$0xff] (!%p223_p2)  ;;  %v315_v5 = vld [vmem:[%s1355_s4 + $0x18] sm:$0x3f] (!%p223_p2) }
   0x6   : > { %226 = sbr.rel (%p223_p2) target bundleno = 309 (0x135), region = 44  ;;  %v1236_v1 = vld [vmem:[%s1354_s3] sm:$0xff] (!%p223_p2)  ;;  %917 = vmatprep.mubr.f32.mxu0 (!%p223_p2), %v1231_v0  ;;  %1175 = vset.pattern.permute.xlu1 (!%p223_p2), %v1184_v2  ;;  %v313_v6 = vld [vmem:[%s1355_s4 + $0x8] sm:$0xff] (!%p223_p2)  ;;  %v319_v20 = vld [vmem:[%s1356_s5 + $0x18] sm:$0x3f] (!%p223_p2)  ;;  %vm716_vm0 = vcmask (!%p223_p2), 220160  }
   0x7   : > { %955 = vmatprep.mubr.f32.mxu1 (!%p223_p2), %v1236_v1  ;;  %1174 = vset.pattern.permute.xlu0 (!%p223_p2), %v1184_v2  ;;  %v312_v4 = vld [vmem:[%s1355_s4] sm:$0xff] (!%p223_p2)  ;;  %v317_v15 = vld [vmem:[%s1356_s5 + $0x8] sm:$0xff] (!%p223_p2)  ;;  %v318_v21 = vld [vmem:[%s1356_s5 + $0x10] sm:$0xff] (!%p223_p2)  ;;  %vm720_vm1 = vcmask (!%p223_p2), 218112  }
   0x8   : > { %332 = vperm.xlu1 (!%p223_p2), %1175, %v314_v3   ;;  %322 = vperm.xlu0 (!%p223_p2), %1174, %v312_v4   ;;  %v316_v16 = vld [vmem:[%s1356_s5] sm:$0xff] (!%p223_p2)  ;;  %v1304_v40 = vld [vmem:[%s1353_s2 + $0x8] sm:$0xff] (!%p223_p2)  ;;  %v306_v45 = vld [vmem:[%s1353_s2 + $0x10] sm:$0xff] (!%p223_p2) }
   0x9   : > { %v1309_v41 = vld [vmem:[%s1354_s3 + $0x8] sm:$0xff] (!%p223_p2)  ;;  %v310_v46 = vld [vmem:[%s1354_s3 + $0x10] sm:$0xff] (!%p223_p2)  ;;  %v307_v47 = vld [vmem:[%s1353_s2 + $0x18] sm:$0x3f] (!%p223_p2) }
   0xa   : > { %v311_v48 = vld [vmem:[%s1354_s3 + $0x18] sm:$0x3f] (!%p223_p2) }
   0xc   : > { %337 = vperm.xlu1 (!%p223_p2), %1175, %v315_v5   ;;  %327 = vperm.xlu0 (!%p223_p2), %1174, %v313_v6  }
   0xd   : > { %s1359_s22 = smov (!%p257_p3, %s789_s22), 1 }
   0xe   : > { %s802_s7 = sshll.u32 %s1359_s22, 7  ;;  %s804_s16 = sshll.u32 %s1359_s22, 5 }
   0xf   : > { %s1257_s12 = scalar_lea.vmem %s1351_s0, %s802_s7  ;;  %s1295_s27 = scalar_lea.vmem %s1352_s1, %s802_s7 }
  0x10   : > { %v272_v7 = vld [vmem:[%s1257_s12] sm:$0xff]  ;;  %v273_v8 = vld [vmem:[%s1257_s12 + $0x8] sm:$0xff]  ;;  %v274_v9 = vld [vmem:[%s1257_s12 + $0x10] sm:$0xff]  ;;  %432 = vperm.xlu1 %1175, %v317_v15   ;;  %427 = vperm.xlu0 %1174, %v316_v16   ;;  %s271_s19 = scalar_lea.vmem %s1357_s6, %s804_s16 }
  0x11   : > { %v1037_v10 = vpack.c.bf16 %v273_v8, %v272_v7  ;;  %v275_v11 = vld [vmem:[%s1257_s12 + $0x18] sm:$0xff]  ;;  %v276_v13 = vld [vmem:[%s1257_s12 + $0x20] sm:$0xff]  ;;  %v277_v14 = vld [vmem:[%s1257_s12 + $0x28] sm:$0xff] }
  0x12   : > { %v1041_v12 = vpack.c.bf16 %v275_v11, %v274_v9  ;;  %v1045_v17 = vpack.c.bf16 %v277_v14, %v276_v13  ;;  %v278_v18 = vld [vmem:[%s1257_s12 + $0x30] sm:$0xff]  ;;  %v279_v19 = vld [vmem:[%s1257_s12 + $0x38] sm:$0xff]  ;;  %v280_v23 = vld [vmem:[%s1257_s12 + $0x40] sm:$0xff] }
  0x13   : > { %1038 = vmatprep.subr.bf16.mxu0 %v1037_v10  ;;  %1070 = vmatprep.subr.bf16.mxu1 %v1037_v10  ;;  %v1049_v22 = vpack.c.bf16 %v279_v19, %v278_v18  ;;  %v281_v24 = vld [vmem:[%s1257_s12 + $0x48] sm:$0xff]  ;;  %v282_v26 = vld [vmem:[%s1257_s12 + $0x50] sm:$0xff]  ;;  %v283_v27 = vld [vmem:[%s1257_s12 + $0x58] sm:$0xff] }
  0x14   : > { %1040 = vmatpush3.bf16.msra.mxu0 %v1037_v10  ;;  %1072 = vmatpush3.bf16.msra.mxu1 %v1037_v10  ;;  %v1053_v25 = vpack.c.bf16 %v281_v24, %v280_v23  ;;  %v1057_v28 = vpack.c.bf16 %v283_v27, %v282_v26  ;;  %v284_v29 = vld [vmem:[%s1257_s12 + $0x60] sm:$0xff]  ;;  %v285_v30 = vld [vmem:[%s1257_s12 + $0x68] sm:$0xff]  ;;  %v286_v32 = vld [vmem:[%s1257_s12 + $0x70] sm:$0xff] }
  0x15   : > { %1042 = vmatprep.subr.bf16.mxu0 %v1041_v12  ;;  %1074 = vmatprep.subr.bf16.mxu1 %v1041_v12  ;;  %v1061_v31 = vpack.c.bf16 %v285_v30, %v284_v29  ;;  %v287_v33 = vld [vmem:[%s1257_s12 + $0x78] sm:$0xff]  ;;  %v288_v35 = vld [vmem:[%s1295_s27] sm:$0xff]  ;;  %v289_v36 = vld [vmem:[%s1295_s27 + $0x8] sm:$0xff] }
  0x16   : > { %442 = vperm.xlu1 %1175, %v319_v20   ;;  %437 = vperm.xlu0 %1174, %v318_v21   ;;  %v1065_v34 = vpack.c.bf16 %v287_v33, %v286_v32  ;;  %v1101_v37 = vpack.c.bf16 %v289_v36, %v288_v35  ;;  %v290_v38 = vld [vmem:[%s1295_s27 + $0x10] sm:$0xff]  ;;  %v291_v39 = vld [vmem:[%s1295_s27 + $0x18] sm:$0xff]  ;;  %v292_v43 = vld [vmem:[%s1295_s27 + $0x20] sm:$0xff] }
  0x17   : > { %v1105_v42 = vpack.c.bf16 %v291_v39, %v290_v38  ;;  %v293_v44 = vld [vmem:[%s1295_s27 + $0x28] sm:$0xff]  ;;  %v294_v50 = vld [vmem:[%s1295_s27 + $0x30] sm:$0xff]  ;;  %v295_v51 = vld [vmem:[%s1295_s27 + $0x38] sm:$0xff] }
  0x18   : > { %1044 = vmatpush3.bf16.msra.mxu0 %v1041_v12  ;;  %1076 = vmatpush3.bf16.msra.mxu1 %v1041_v12  ;;  %v1109_v49 = vpack.c.bf16 %v293_v44, %v292_v43  ;;  %v1113_v52 = vpack.c.bf16 %v295_v51, %v294_v50  ;;  %v296_v53 = vld [vmem:[%s1295_s27 + $0x40] sm:$0xff]  ;;  %v297_v54 = vld [vmem:[%s1295_s27 + $0x48] sm:$0xff]  ;;  %v298_v56 = vld [vmem:[%s1295_s27 + $0x50] sm:$0xff] }
  0x19   : > { %1046 = vmatprep.subr.bf16.mxu0 %v1045_v17  ;;  %1078 = vmatprep.subr.bf16.mxu1 %v1045_v17  ;;  %v1117_v55 = vpack.c.bf16 %v297_v54, %v296_v53  ;;  %v299_v57 = vld [vmem:[%s1295_s27 + $0x58] sm:$0xff]  ;;  %v300_v59 = vld [vmem:[%s1295_s27 + $0x60] sm:$0xff]  ;;  %v301_v60 = vld [vmem:[%s1295_s27 + $0x68] sm:$0xff] }
  0x1a   : > { %v1121_v58 = vpack.c.bf16 %v299_v57, %v298_v56  ;;  %v1125_v61 = vpack.c.bf16 %v301_v60, %v300_v59  ;;  %v302_v62 = vld [vmem:[%s1295_s27 + $0x70] sm:$0xff]  ;;  %v303_v63 = vld [vmem:[%s1295_s27 + $0x78] sm:$0xff] }
  0x1c   : > { %1048 = vmatpush3.bf16.msra.mxu0 %v1045_v17  ;;  %1080 = vmatpush3.bf16.msra.mxu1 %v1045_v17 }
  0x1d   : > { %1050 = vmatprep.subr.bf16.mxu0 %v1049_v22  ;;  %1082 = vmatprep.subr.bf16.mxu1 %v1049_v22 }
  0x20   : > { %1052 = vmatpush3.bf16.msra.mxu0 %v1049_v22  ;;  %1084 = vmatpush3.bf16.msra.mxu1 %v1049_v22 }
  0x21   : > { %1054 = vmatprep.subr.bf16.mxu0 %v1053_v25  ;;  %1086 = vmatprep.subr.bf16.mxu1 %v1053_v25 }
  0x24   : > { %1056 = vmatpush3.bf16.msra.mxu0 %v1053_v25  ;;  %1088 = vmatpush3.bf16.msra.mxu1 %v1053_v25 }
  0x25   : > { %1058 = vmatprep.subr.bf16.mxu0 %v1057_v28  ;;  %1090 = vmatprep.subr.bf16.mxu1 %v1057_v28 }
  0x28   : > { %1060 = vmatpush3.bf16.msra.mxu0 %v1057_v28  ;;  %1092 = vmatpush3.bf16.msra.mxu1 %v1057_v28 }
  0x29   : > { %1062 = vmatprep.subr.bf16.mxu0 %v1061_v31  ;;  %1094 = vmatprep.subr.bf16.mxu1 %v1061_v31 }
  0x2c   : > { %1064 = vmatpush3.bf16.msra.mxu0 %v1061_v31  ;;  %1096 = vmatpush3.bf16.msra.mxu1 %v1061_v31 }
  0x2d   : > { %1066 = vmatprep.subr.bf16.mxu0 %v1065_v34  ;;  %1098 = vmatprep.subr.bf16.mxu1 %v1065_v34 }
  0x30   : > { %1068 = vmatpush3.bf16.msra.mxu0 %v1065_v34  ;;  %1100 = vmatpush3.bf16.msra.mxu1 %v1065_v34 }
  0x31   : > { %1102 = vmatprep.subr.bf16.mxu0 %v1101_v37  ;;  %1134 = vmatprep.subr.bf16.mxu1 %v1101_v37 }
  0x33   : > { %918 = vmatmul.mubr.f32.vlgmr.msra.gmra.mrb[0].mxu0 %v1304_v40  ;;  %956 = vmatmul.mubr.f32.vlgmr.msra.gmra.mrb[0].mxu1 %v1309_v41 }
  0x34   : > { %1104 = vmatpush3.bf16.msra.mxu0 %v1101_v37  ;;  %1136 = vmatpush3.bf16.msra.mxu1 %v1101_v37 }
  0x35   : > { %1106 = vmatprep.subr.bf16.mxu0 %v1105_v42  ;;  %1138 = vmatprep.subr.bf16.mxu1 %v1105_v42 }
  0x36   : > { %920 = vmatprep.mubr.f32.mxu0 %v306_v45  ;;  %958 = vmatprep.mubr.f32.mxu1 %v310_v46 }
  0x37   : > { %921 = vmatmul.mubr.f32.gmra.mrb[2].mxu0 %v307_v47  ;;  %959 = vmatmul.mubr.f32.gmra.mrb[2].mxu1 %v311_v48 }
  0x38   : > { %1108 = vmatpush3.bf16.msra.mxu0 %v1105_v42  ;;  %1140 = vmatpush3.bf16.msra.mxu1 %v1105_v42 }
  0x39   : > { %1110 = vmatprep.subr.bf16.mxu0 %v1109_v49  ;;  %1142 = vmatprep.subr.bf16.mxu1 %v1109_v49 }
  0x3a   : > { %993 = vmatprep.mubr.f32.mxu0 %v1231_v0  ;;  %1031 = vmatprep.mubr.f32.mxu1 %v1236_v1  ;;  %v1129_v0 = vpack.c.bf16 %v303_v63, %v302_v62 }
  0x3c   : > { %1112 = vmatpush3.bf16.msra.mxu0 %v1109_v49  ;;  %1144 = vmatpush3.bf16.msra.mxu1 %v1109_v49 }
  0x3d   : > { %1114 = vmatprep.subr.bf16.mxu0 %v1113_v52  ;;  %1146 = vmatprep.subr.bf16.mxu1 %v1113_v52 }
  0x40   : > { %1116 = vmatpush3.bf16.msra.mxu0 %v1113_v52  ;;  %1148 = vmatpush3.bf16.msra.mxu1 %v1113_v52 }
  0x41   : > { %1118 = vmatprep.subr.bf16.mxu0 %v1117_v55  ;;  %1150 = vmatprep.subr.bf16.mxu1 %v1117_v55 }
  0x44   : > { %1120 = vmatpush3.bf16.msra.mxu0 %v1117_v55  ;;  %1152 = vmatpush3.bf16.msra.mxu1 %v1117_v55 }
  0x45   : > { %1122 = vmatprep.subr.bf16.mxu0 %v1121_v58  ;;  %1154 = vmatprep.subr.bf16.mxu1 %v1121_v58 }
  0x48   : > { %1124 = vmatpush3.bf16.msra.mxu0 %v1121_v58  ;;  %1156 = vmatpush3.bf16.msra.mxu1 %v1121_v58 }
  0x49   : > { %1126 = vmatprep.subr.bf16.mxu0 %v1125_v61  ;;  %1158 = vmatprep.subr.bf16.mxu1 %v1125_v61 }
  0x4c   : > { %1128 = vmatpush3.bf16.msra.mxu0 %v1125_v61  ;;  %1160 = vmatpush3.bf16.msra.mxu1 %v1125_v61 }
  0x4d   : > { %1130 = vmatprep.subr.bf16.mxu0 %v1129_v0  ;;  %1162 = vmatprep.subr.bf16.mxu1 %v1129_v0 }
  0x50   : > { %1132 = vmatpush3.bf16.msra.mxu0 %v1129_v0  ;;  %1164 = vmatpush3.bf16.msra.mxu1 %v1129_v0 }
  0x53   : > { %994 = vmatmul.mubr.f32.vlgmr.msra.gmra.mrb[4].mxu0 %v1304_v40  ;;  %1032 = vmatmul.mubr.f32.vlgmr.msra.gmra.mrb[4].mxu1 %v1309_v41 }
  0x54   : > { %996 = vmatprep.mubr.f32.mxu0 %v306_v45  ;;  %1034 = vmatprep.mubr.f32.mxu1 %v310_v46 }
  0x57   : > { %997 = vmatmul.mubr.f32.gmra.mrb[6].mxu0 %v307_v47  ;;  %1035 = vmatmul.mubr.f32.gmra.mrb[6].mxu1 %v311_v48 }
  0x87   : > { %v333_v1 = vpop.permute.xlu1 %332  ;;  %v323_v2 = vpop.permute.xlu0 %322 }
  0x8b   : > { %v338_v3 = vpop.permute.xlu1 %337  ;;  %v328_v4 = vpop.permute.xlu0 %327 }
  0x8f   : > { %v433_v5 = vpop.permute.xlu1 %432  ;;  %v428_v6 = vpop.permute.xlu0 %427 }
  0x95   : > { %v443_v15 = vpop.permute.xlu1 %442  ;;  %v438_v17 = vpop.permute.xlu0 %437 }
 0x106   : > { %v919_v7 = vpop.f32.mrb[0].mxu0  ;;  %v957_v8 = vpop.f32.mrb[0].mxu1 }
 0x107   : > { %v412_v9 = vadd.f32 %v919_v7, %v328_v4  ;;  %v517_v10 = vadd.f32 %v957_v8, %v433_v5  ;;  %v406_v11 = vpop.f32.mrb[1].mxu0  ;;  %v511_v12 = vpop.f32.mrb[1].mxu1 }
 0x108   : > { %v407_v13 = vadd.f32 %v406_v11, %v323_v2  ;;  %v512_v14 = vadd.f32 %v511_v12, %v428_v6 }
 0x109   : > { %v701_v16 = vmax.f32 %v412_v9, %v517_v10 }
 0x10a   : > { %v700_v18 = vmax.f32 %v407_v13, %v512_v14  ;;  %v922_v19 = vpop.f32.mrb[2].mxu0  ;;  %v960_v20 = vpop.f32.mrb[2].mxu1 }
 0x10b   : > { %v422_v21 = vadd.f32 %v922_v19, %v338_v3  ;;  %v527_v22 = vadd.f32 %v960_v20, %v443_v15  ;;  %v416_v23 = vpop.f32.mrb[3].mxu0  ;;  %v521_v24 = vpop.f32.mrb[3].mxu1 }
 0x10c   : > { %v417_v25 = vadd.f32 %v416_v23, %v333_v1  ;;  %v522_v26 = vadd.f32 %v521_v24, %v438_v17 }
 0x10d   : > { %v703_v27 = vmax.f32 %v422_v21, %v527_v22 }
 0x10e   : > { %v702_v28 = vmax.f32 %v417_v25, %v522_v26 }
 0x126   : > { %v995_v29 = vpop.f32.mrb[4].mxu0  ;;  %v1033_v30 = vpop.f32.mrb[4].mxu1 }
 0x127   : > { %v602_v31 = vadd.f32 %v995_v29, %v328_v4  ;;  %v687_v32 = vadd.f32 %v1033_v30, %v433_v5  ;;  %v596_v33 = vpop.f32.mrb[5].mxu0  ;;  %v681_v34 = vpop.f32.mrb[5].mxu1 }
 0x128   : > { %v597_v35 = vadd.f32 %v596_v33, %v323_v2  ;;  %v682_v36 = vadd.f32 %v681_v34, %v428_v6 }
 0x129   : > { %v705_v37 = vmax.f32 %v602_v31, %v687_v32 }
 0x12a   : > { %v704_v38 = vmax.f32 %v597_v35, %v682_v36  ;;  %v998_v39 = vpop.f32.mrb[6].mxu0  ;;  %v1036_v40 = vpop.f32.mrb[6].mxu1 }
 0x12b   : > { %v709_v41 = vmax.f32 %v701_v16, %v705_v37  ;;  %v612_v42 = vadd.f32 %v998_v39, %v338_v3  ;;  %v697_v43 = vadd.f32 %v1036_v40, %v443_v15  ;;  %v606_v44 = vpop.f32.mrb[7].mxu0  ;;  %v691_v45 = vpop.f32.mrb[7].mxu1 }
 0x12c   : > { %v708_v46 = vmax.f32 %v700_v18, %v704_v38  ;;  %v607_v47 = vadd.f32 %v606_v44, %v333_v1  ;;  %v692_v48 = vadd.f32 %v691_v45, %v438_v17 }
 0x12d   : > { %v713_v49 = vmax.f32 %v709_v41, 0.0  ;;  %v707_v50 = vmax.f32 %v612_v42, %v697_v43 }
 0x12e   : > { %v712_v51 = vmax.f32 %v708_v46, 0.0  ;;  %v706_v52 = vmax.f32 %v607_v47, %v692_v48 }
 0x12f   : > { %718 = vst.msk [vmem:[%s271_s19 + $0x8] sm:$0xff] %vm716_vm0, %v713_v49  ;;  %v711_v53 = vmax.f32 %v703_v27, %v707_v50 }
 0x130   : > { %717 = vst.msk [vmem:[%s271_s19] sm:$0xff] %vm716_vm0, %v712_v51  ;;  %v710_v54 = vmax.f32 %v702_v28, %v706_v52 }
 0x131   : > { %v715_v55 = vmax.f32 %v711_v53, 0.0 }
 0x132   : > { %v714_v56 = vmax.f32 %v710_v54, 0.0 }
 0x133   : > { %721 = vst.msk [vmem:[%s271_s19 + $0x18] sm:$0x3f] %vm720_vm1, %v715_v55 }
 0x134   : > { %719 = vst.msk [vmem:[%s271_s19 + $0x10] sm:$0xff] %vm716_vm0, %v714_v56 }
 0x135 PF: > { %s16_s21 = sadd.s32 1, %s1182_s21  }
 0x136   : > { %p13_p4 = scmp.ge.s32.totalorder %s16_s21, 4  }
 0x138   :  { %15 = sbr.rel (!%p13_p4) target bundleno = 1 (0x1), region = 77 }

// kernel: cnn_forward.4
= control target key start
LH: loop header
LB: loop body
LE: loop exit
PB: predicated region body
PF: predicated region fallthrough
CT: control target
= control target key end

     0   :  { %s1220_s21 = smov 0   ;;  %s1351_s0 = inlined_call_operand.vmem [shape: f32[2,128,14], index: 0, kind: input, shape index: {}]   ;;  %s1352_s1 = inlined_call_operand.vmem [shape: f32[2,128,14], index: 1, kind: input, shape index: {}]   ;;  %s1353_s2 = inlined_call_operand.vmem [shape: f32[30,128], index: 2, kind: input, shape index: {}]   ;;  %s1354_s3 = inlined_call_operand.vmem [shape: f32[30,128], index: 3, kind: input, shape index: {}]   ;;  %s1355_s4 = inlined_call_operand.vmem [shape: f32[30,1], index: 4, kind: input, shape index: {}]   ;;  %s1356_s5 = inlined_call_operand.vmem [shape: f32[30,1], index: 5, kind: input, shape index: {}]   ;;  %s1357_s6 = inlined_call_operand.vmem [shape: f32[2,30,14], index: 6, kind: output, shape index: {}]  }
   0x1 LB: > { %s789_s22 = sadd.s32 4294967295, %s1182_s21   ;;  %p793_p0 = scmp.ge.s32.totalorder %s1182_s21, 1  ;;  %s1182_s21 = sphi %s1220_s21, %s16_s21  }
   0x2   : > { %p222_p1 = scmp.lt.s32.totalorder %s1182_s21, 3 }
   0x4   : > { %p223_p2 = pnand %p793_p0, %p222_p1 }
   0x5   : > { %p257_p3 = scmp.lt.s32.totalorder (!%p223_p2), %s789_s22, 1  ;;  %v1231_v0 = vld [vmem:[%s1353_s2] sm:$0xff] (!%p223_p2)  ;;  %v1184_v2 = vmov (!%p223_p2), 0   ;;  %v314_v3 = vld [vmem:[%s1355_s4 + $0x10] sm:$0xff] (!%p223_p2)  ;;  %v315_v5 = vld [vmem:[%s1355_s4 + $0x18] sm:$0x3f] (!%p223_p2) }
   0x6   : > { %226 = sbr.rel (%p223_p2) target bundleno = 309 (0x135), region = 44  ;;  %v1236_v1 = vld [vmem:[%s1354_s3] sm:$0xff] (!%p223_p2)  ;;  %917 = vmatprep.mubr.f32.mxu0 (!%p223_p2), %v1231_v0  ;;  %1175 = vset.pattern.permute.xlu1 (!%p223_p2), %v1184_v2  ;;  %v313_v6 = vld [vmem:[%s1355_s4 + $0x8] sm:$0xff] (!%p223_p2)  ;;  %v319_v20 = vld [vmem:[%s1356_s5 + $0x18] sm:$0x3f] (!%p223_p2)  ;;  %vm716_vm0 = vcmask (!%p223_p2), 113664  }
   0x7   : > { %955 = vmatprep.mubr.f32.mxu1 (!%p223_p2), %v1236_v1  ;;  %1174 = vset.pattern.permute.xlu0 (!%p223_p2), %v1184_v2  ;;  %v312_v4 = vld [vmem:[%s1355_s4] sm:$0xff] (!%p223_p2)  ;;  %v317_v15 = vld [vmem:[%s1356_s5 + $0x8] sm:$0xff] (!%p223_p2)  ;;  %v318_v21 = vld [vmem:[%s1356_s5 + $0x10] sm:$0xff] (!%p223_p2)  ;;  %vm720_vm1 = vcmask (!%p223_p2), 111616  }
   0x8   : > { %332 = vperm.xlu1 (!%p223_p2), %1175, %v314_v3   ;;  %322 = vperm.xlu0 (!%p223_p2), %1174, %v312_v4   ;;  %v316_v16 = vld [vmem:[%s1356_s5] sm:$0xff] (!%p223_p2)  ;;  %v1304_v40 = vld [vmem:[%s1353_s2 + $0x8] sm:$0xff] (!%p223_p2)  ;;  %v306_v45 = vld [vmem:[%s1353_s2 + $0x10] sm:$0xff] (!%p223_p2) }
   0x9   : > { %v1309_v41 = vld [vmem:[%s1354_s3 + $0x8] sm:$0xff] (!%p223_p2)  ;;  %v310_v46 = vld [vmem:[%s1354_s3 + $0x10] sm:$0xff] (!%p223_p2)  ;;  %v307_v47 = vld [vmem:[%s1353_s2 + $0x18] sm:$0x3f] (!%p223_p2) }
   0xa   : > { %v311_v48 = vld [vmem:[%s1354_s3 + $0x18] sm:$0x3f] (!%p223_p2) }
   0xc   : > { %337 = vperm.xlu1 (!%p223_p2), %1175, %v315_v5   ;;  %327 = vperm.xlu0 (!%p223_p2), %1174, %v313_v6  }
   0xd   : > { %s1359_s22 = smov (!%p257_p3, %s789_s22), 1 }
   0xe   : > { %s802_s7 = sshll.u32 %s1359_s22, 7  ;;  %s804_s16 = sshll.u32 %s1359_s22, 5 }
   0xf   : > { %s1257_s12 = scalar_lea.vmem %s1351_s0, %s802_s7  ;;  %s1295_s27 = scalar_lea.vmem %s1352_s1, %s802_s7 }
  0x10   : > { %v272_v7 = vld [vmem:[%s1257_s12] sm:$0xff]  ;;  %v273_v8 = vld [vmem:[%s1257_s12 + $0x8] sm:$0xff]  ;;  %v274_v9 = vld [vmem:[%s1257_s12 + $0x10] sm:$0xff]  ;;  %432 = vperm.xlu1 %1175, %v317_v15   ;;  %427 = vperm.xlu0 %1174, %v316_v16   ;;  %s271_s19 = scalar_lea.vmem %s1357_s6, %s804_s16 }
  0x11   : > { %v1037_v10 = vpack.c.bf16 %v273_v8, %v272_v7  ;;  %v275_v11 = vld [vmem:[%s1257_s12 + $0x18] sm:$0xff]  ;;  %v276_v13 = vld [vmem:[%s1257_s12 + $0x20] sm:$0xff]  ;;  %v277_v14 = vld [vmem:[%s1257_s12 + $0x28] sm:$0xff] }
  0x12   : > { %v1041_v12 = vpack.c.bf16 %v275_v11, %v274_v9  ;;  %v1045_v17 = vpack.c.bf16 %v277_v14, %v276_v13  ;;  %v278_v18 = vld [vmem:[%s1257_s12 + $0x30] sm:$0xff]  ;;  %v279_v19 = vld [vmem:[%s1257_s12 + $0x38] sm:$0xff]  ;;  %v280_v23 = vld [vmem:[%s1257_s12 + $0x40] sm:$0xff] }
  0x13   : > { %1038 = vmatprep.subr.bf16.mxu0 %v1037_v10  ;;  %1070 = vmatprep.subr.bf16.mxu1 %v1037_v10  ;;  %v1049_v22 = vpack.c.bf16 %v279_v19, %v278_v18  ;;  %v281_v24 = vld [vmem:[%s1257_s12 + $0x48] sm:$0xff]  ;;  %v282_v26 = vld [vmem:[%s1257_s12 + $0x50] sm:$0xff]  ;;  %v283_v27 = vld [vmem:[%s1257_s12 + $0x58] sm:$0xff] }
  0x14   : > { %1040 = vmatpush3.bf16.msra.mxu0 %v1037_v10  ;;  %1072 = vmatpush3.bf16.msra.mxu1 %v1037_v10  ;;  %v1053_v25 = vpack.c.bf16 %v281_v24, %v280_v23  ;;  %v1057_v28 = vpack.c.bf16 %v283_v27, %v282_v26  ;;  %v284_v29 = vld [vmem:[%s1257_s12 + $0x60] sm:$0xff]  ;;  %v285_v30 = vld [vmem:[%s1257_s12 + $0x68] sm:$0xff]  ;;  %v286_v32 = vld [vmem:[%s1257_s12 + $0x70] sm:$0xff] }
  0x15   : > { %1042 = vmatprep.subr.bf16.mxu0 %v1041_v12  ;;  %1074 = vmatprep.subr.bf16.mxu1 %v1041_v12  ;;  %v1061_v31 = vpack.c.bf16 %v285_v30, %v284_v29  ;;  %v287_v33 = vld [vmem:[%s1257_s12 + $0x78] sm:$0xff]  ;;  %v288_v35 = vld [vmem:[%s1295_s27] sm:$0xff]  ;;  %v289_v36 = vld [vmem:[%s1295_s27 + $0x8] sm:$0xff] }
  0x16   : > { %442 = vperm.xlu1 %1175, %v319_v20   ;;  %437 = vperm.xlu0 %1174, %v318_v21   ;;  %v1065_v34 = vpack.c.bf16 %v287_v33, %v286_v32  ;;  %v1101_v37 = vpack.c.bf16 %v289_v36, %v288_v35  ;;  %v290_v38 = vld [vmem:[%s1295_s27 + $0x10] sm:$0xff]  ;;  %v291_v39 = vld [vmem:[%s1295_s27 + $0x18] sm:$0xff]  ;;  %v292_v43 = vld [vmem:[%s1295_s27 + $0x20] sm:$0xff] }
  0x17   : > { %v1105_v42 = vpack.c.bf16 %v291_v39, %v290_v38  ;;  %v293_v44 = vld [vmem:[%s1295_s27 + $0x28] sm:$0xff]  ;;  %v294_v50 = vld [vmem:[%s1295_s27 + $0x30] sm:$0xff]  ;;  %v295_v51 = vld [vmem:[%s1295_s27 + $0x38] sm:$0xff] }
  0x18   : > { %1044 = vmatpush3.bf16.msra.mxu0 %v1041_v12  ;;  %1076 = vmatpush3.bf16.msra.mxu1 %v1041_v12  ;;  %v1109_v49 = vpack.c.bf16 %v293_v44, %v292_v43  ;;  %v1113_v52 = vpack.c.bf16 %v295_v51, %v294_v50  ;;  %v296_v53 = vld [vmem:[%s1295_s27 + $0x40] sm:$0xff]  ;;  %v297_v54 = vld [vmem:[%s1295_s27 + $0x48] sm:$0xff]  ;;  %v298_v56 = vld [vmem:[%s1295_s27 + $0x50] sm:$0xff] }
  0x19   : > { %1046 = vmatprep.subr.bf16.mxu0 %v1045_v17  ;;  %1078 = vmatprep.subr.bf16.mxu1 %v1045_v17  ;;  %v1117_v55 = vpack.c.bf16 %v297_v54, %v296_v53  ;;  %v299_v57 = vld [vmem:[%s1295_s27 + $0x58] sm:$0xff]  ;;  %v300_v59 = vld [vmem:[%s1295_s27 + $0x60] sm:$0xff]  ;;  %v301_v60 = vld [vmem:[%s1295_s27 + $0x68] sm:$0xff] }
  0x1a   : > { %v1121_v58 = vpack.c.bf16 %v299_v57, %v298_v56  ;;  %v1125_v61 = vpack.c.bf16 %v301_v60, %v300_v59  ;;  %v302_v62 = vld [vmem:[%s1295_s27 + $0x70] sm:$0xff]  ;;  %v303_v63 = vld [vmem:[%s1295_s27 + $0x78] sm:$0xff] }
  0x1c   : > { %1048 = vmatpush3.bf16.msra.mxu0 %v1045_v17  ;;  %1080 = vmatpush3.bf16.msra.mxu1 %v1045_v17 }
  0x1d   : > { %1050 = vmatprep.subr.bf16.mxu0 %v1049_v22  ;;  %1082 = vmatprep.subr.bf16.mxu1 %v1049_v22 }
  0x20   : > { %1052 = vmatpush3.bf16.msra.mxu0 %v1049_v22  ;;  %1084 = vmatpush3.bf16.msra.mxu1 %v1049_v22 }
  0x21   : > { %1054 = vmatprep.subr.bf16.mxu0 %v1053_v25  ;;  %1086 = vmatprep.subr.bf16.mxu1 %v1053_v25 }
  0x24   : > { %1056 = vmatpush3.bf16.msra.mxu0 %v1053_v25  ;;  %1088 = vmatpush3.bf16.msra.mxu1 %v1053_v25 }
  0x25   : > { %1058 = vmatprep.subr.bf16.mxu0 %v1057_v28  ;;  %1090 = vmatprep.subr.bf16.mxu1 %v1057_v28 }
  0x28   : > { %1060 = vmatpush3.bf16.msra.mxu0 %v1057_v28  ;;  %1092 = vmatpush3.bf16.msra.mxu1 %v1057_v28 }
  0x29   : > { %1062 = vmatprep.subr.bf16.mxu0 %v1061_v31  ;;  %1094 = vmatprep.subr.bf16.mxu1 %v1061_v31 }
  0x2c   : > { %1064 = vmatpush3.bf16.msra.mxu0 %v1061_v31  ;;  %1096 = vmatpush3.bf16.msra.mxu1 %v1061_v31 }
  0x2d   : > { %1066 = vmatprep.subr.bf16.mxu0 %v1065_v34  ;;  %1098 = vmatprep.subr.bf16.mxu1 %v1065_v34 }
  0x30   : > { %1068 = vmatpush3.bf16.msra.mxu0 %v1065_v34  ;;  %1100 = vmatpush3.bf16.msra.mxu1 %v1065_v34 }
  0x31   : > { %1102 = vmatprep.subr.bf16.mxu0 %v1101_v37  ;;  %1134 = vmatprep.subr.bf16.mxu1 %v1101_v37 }
  0x33   : > { %918 = vmatmul.mubr.f32.vlgmr.msra.gmra.mrb[0].mxu0 %v1304_v40  ;;  %956 = vmatmul.mubr.f32.vlgmr.msra.gmra.mrb[0].mxu1 %v1309_v41 }
  0x34   : > { %1104 = vmatpush3.bf16.msra.mxu0 %v1101_v37  ;;  %1136 = vmatpush3.bf16.msra.mxu1 %v1101_v37 }
  0x35   : > { %1106 = vmatprep.subr.bf16.mxu0 %v1105_v42  ;;  %1138 = vmatprep.subr.bf16.mxu1 %v1105_v42 }
  0x36   : > { %920 = vmatprep.mubr.f32.mxu0 %v306_v45  ;;  %958 = vmatprep.mubr.f32.mxu1 %v310_v46 }
  0x37   : > { %921 = vmatmul.mubr.f32.gmra.mrb[2].mxu0 %v307_v47  ;;  %959 = vmatmul.mubr.f32.gmra.mrb[2].mxu1 %v311_v48 }
  0x38   : > { %1108 = vmatpush3.bf16.msra.mxu0 %v1105_v42  ;;  %1140 = vmatpush3.bf16.msra.mxu1 %v1105_v42 }
  0x39   : > { %1110 = vmatprep.subr.bf16.mxu0 %v1109_v49  ;;  %1142 = vmatprep.subr.bf16.mxu1 %v1109_v49 }
  0x3a   : > { %993 = vmatprep.mubr.f32.mxu0 %v1231_v0  ;;  %1031 = vmatprep.mubr.f32.mxu1 %v1236_v1  ;;  %v1129_v0 = vpack.c.bf16 %v303_v63, %v302_v62 }
  0x3c   : > { %1112 = vmatpush3.bf16.msra.mxu0 %v1109_v49  ;;  %1144 = vmatpush3.bf16.msra.mxu1 %v1109_v49 }
  0x3d   : > { %1114 = vmatprep.subr.bf16.mxu0 %v1113_v52  ;;  %1146 = vmatprep.subr.bf16.mxu1 %v1113_v52 }
  0x40   : > { %1116 = vmatpush3.bf16.msra.mxu0 %v1113_v52  ;;  %1148 = vmatpush3.bf16.msra.mxu1 %v1113_v52 }
  0x41   : > { %1118 = vmatprep.subr.bf16.mxu0 %v1117_v55  ;;  %1150 = vmatprep.subr.bf16.mxu1 %v1117_v55 }
  0x44   : > { %1120 = vmatpush3.bf16.msra.mxu0 %v1117_v55  ;;  %1152 = vmatpush3.bf16.msra.mxu1 %v1117_v55 }
  0x45   : > { %1122 = vmatprep.subr.bf16.mxu0 %v1121_v58  ;;  %1154 = vmatprep.subr.bf16.mxu1 %v1121_v58 }
  0x48   : > { %1124 = vmatpush3.bf16.msra.mxu0 %v1121_v58  ;;  %1156 = vmatpush3.bf16.msra.mxu1 %v1121_v58 }
  0x49   : > { %1126 = vmatprep.subr.bf16.mxu0 %v1125_v61  ;;  %1158 = vmatprep.subr.bf16.mxu1 %v1125_v61 }
  0x4c   : > { %1128 = vmatpush3.bf16.msra.mxu0 %v1125_v61  ;;  %1160 = vmatpush3.bf16.msra.mxu1 %v1125_v61 }
  0x4d   : > { %1130 = vmatprep.subr.bf16.mxu0 %v1129_v0  ;;  %1162 = vmatprep.subr.bf16.mxu1 %v1129_v0 }
  0x50   : > { %1132 = vmatpush3.bf16.msra.mxu0 %v1129_v0  ;;  %1164 = vmatpush3.bf16.msra.mxu1 %v1129_v0 }
  0x53   : > { %994 = vmatmul.mubr.f32.vlgmr.msra.gmra.mrb[4].mxu0 %v1304_v40  ;;  %1032 = vmatmul.mubr.f32.vlgmr.msra.gmra.mrb[4].mxu1 %v1309_v41 }
  0x54   : > { %996 = vmatprep.mubr.f32.mxu0 %v306_v45  ;;  %1034 = vmatprep.mubr.f32.mxu1 %v310_v46 }
  0x57   : > { %997 = vmatmul.mubr.f32.gmra.mrb[6].mxu0 %v307_v47  ;;  %1035 = vmatmul.mubr.f32.gmra.mrb[6].mxu1 %v311_v48 }
  0x87   : > { %v333_v1 = vpop.permute.xlu1 %332  ;;  %v323_v2 = vpop.permute.xlu0 %322 }
  0x8b   : > { %v338_v3 = vpop.permute.xlu1 %337  ;;  %v328_v4 = vpop.permute.xlu0 %327 }
  0x8f   : > { %v433_v5 = vpop.permute.xlu1 %432  ;;  %v428_v6 = vpop.permute.xlu0 %427 }
  0x95   : > { %v443_v15 = vpop.permute.xlu1 %442  ;;  %v438_v17 = vpop.permute.xlu0 %437 }
 0x106   : > { %v919_v7 = vpop.f32.mrb[0].mxu0  ;;  %v957_v8 = vpop.f32.mrb[0].mxu1 }
 0x107   : > { %v412_v9 = vadd.f32 %v919_v7, %v328_v4  ;;  %v517_v10 = vadd.f32 %v957_v8, %v433_v5  ;;  %v406_v11 = vpop.f32.mrb[1].mxu0  ;;  %v511_v12 = vpop.f32.mrb[1].mxu1 }
 0x108   : > { %v407_v13 = vadd.f32 %v406_v11, %v323_v2  ;;  %v512_v14 = vadd.f32 %v511_v12, %v428_v6 }
 0x109   : > { %v701_v16 = vmax.f32 %v412_v9, %v517_v10 }
 0x10a   : > { %v700_v18 = vmax.f32 %v407_v13, %v512_v14  ;;  %v922_v19 = vpop.f32.mrb[2].mxu0  ;;  %v960_v20 = vpop.f32.mrb[2].mxu1 }
 0x10b   : > { %v422_v21 = vadd.f32 %v922_v19, %v338_v3  ;;  %v527_v22 = vadd.f32 %v960_v20, %v443_v15  ;;  %v416_v23 = vpop.f32.mrb[3].mxu0  ;;  %v521_v24 = vpop.f32.mrb[3].mxu1 }
 0x10c   : > { %v417_v25 = vadd.f32 %v416_v23, %v333_v1  ;;  %v522_v26 = vadd.f32 %v521_v24, %v438_v17 }
 0x10d   : > { %v703_v27 = vmax.f32 %v422_v21, %v527_v22 }
 0x10e   : > { %v702_v28 = vmax.f32 %v417_v25, %v522_v26 }
 0x126   : > { %v995_v29 = vpop.f32.mrb[4].mxu0  ;;  %v1033_v30 = vpop.f32.mrb[4].mxu1 }
 0x127   : > { %v602_v31 = vadd.f32 %v995_v29, %v328_v4  ;;  %v687_v32 = vadd.f32 %v1033_v30, %v433_v5  ;;  %v596_v33 = vpop.f32.mrb[5].mxu0  ;;  %v681_v34 = vpop.f32.mrb[5].mxu1 }
 0x128   : > { %v597_v35 = vadd.f32 %v596_v33, %v323_v2  ;;  %v682_v36 = vadd.f32 %v681_v34, %v428_v6 }
 0x129   : > { %v705_v37 = vmax.f32 %v602_v31, %v687_v32 }
 0x12a   : > { %v704_v38 = vmax.f32 %v597_v35, %v682_v36  ;;  %v998_v39 = vpop.f32.mrb[6].mxu0  ;;  %v1036_v40 = vpop.f32.mrb[6].mxu1 }
 0x12b   : > { %v709_v41 = vmax.f32 %v701_v16, %v705_v37  ;;  %v612_v42 = vadd.f32 %v998_v39, %v338_v3  ;;  %v697_v43 = vadd.f32 %v1036_v40, %v443_v15  ;;  %v606_v44 = vpop.f32.mrb[7].mxu0  ;;  %v691_v45 = vpop.f32.mrb[7].mxu1 }
 0x12c   : > { %v708_v46 = vmax.f32 %v700_v18, %v704_v38  ;;  %v607_v47 = vadd.f32 %v606_v44, %v333_v1  ;;  %v692_v48 = vadd.f32 %v691_v45, %v438_v17 }
 0x12d   : > { %v713_v49 = vmax.f32 %v709_v41, 0.0  ;;  %v707_v50 = vmax.f32 %v612_v42, %v697_v43 }
 0x12e   : > { %v712_v51 = vmax.f32 %v708_v46, 0.0  ;;  %v706_v52 = vmax.f32 %v607_v47, %v692_v48 }
 0x12f   : > { %718 = vst.msk [vmem:[%s271_s19 + $0x8] sm:$0xff] %vm716_vm0, %v713_v49  ;;  %v711_v53 = vmax.f32 %v703_v27, %v707_v50 }
 0x130   : > { %717 = vst.msk [vmem:[%s271_s19] sm:$0xff] %vm716_vm0, %v712_v51  ;;  %v710_v54 = vmax.f32 %v702_v28, %v706_v52 }
 0x131   : > { %v715_v55 = vmax.f32 %v711_v53, 0.0 }
 0x132   : > { %v714_v56 = vmax.f32 %v710_v54, 0.0 }
 0x133   : > { %721 = vst.msk [vmem:[%s271_s19 + $0x18] sm:$0x3f] %vm720_vm1, %v715_v55 }
 0x134   : > { %719 = vst.msk [vmem:[%s271_s19 + $0x10] sm:$0xff] %vm716_vm0, %v714_v56 }
 0x135 PF: > { %s16_s21 = sadd.s32 1, %s1182_s21  }
 0x136   : > { %p13_p4 = scmp.ge.s32.totalorder %s16_s21, 4  }
 0x138   :  { %15 = sbr.rel (!%p13_p4) target bundleno = 1 (0x1), region = 77 }

// kernel: cnn_forward.5
= control target key start
LH: loop header
LB: loop body
LE: loop exit
PB: predicated region body
PF: predicated region fallthrough
CT: control target
= control target key end

     0   :  { %14 = vsyncpa [#allocation4], 0  ;;  %v813_v47 = vmov 1983009808   ;;  %v106_v49 = vlaneseq  ;;  %s1165_s0 = inlined_call_operand.vmem [shape: f32[2,512], index: 0, kind: input, shape index: {}]   ;;  %s1166_s1 = inlined_call_operand.vmem [shape: f32[512,128], index: 1, kind: input, shape index: {}]   ;;  %s1167_s2 = inlined_call_operand.vmem [shape: f32[1,128], index: 2, kind: input, shape index: {}]   ;;  %s1168_s3 = inlined_call_operand.vmem [shape: f32[128,50], index: 3, kind: input, shape index: {}]   ;;  %s1169_s4 = inlined_call_operand.vmem [shape: f32[1,50], index: 4, kind: input, shape index: {}]   ;;  %s1170_s5 = inlined_call_operand.vmem [shape: f32[50,10], index: 5, kind: input, shape index: {}]   ;;  %s1171_s6 = inlined_call_operand.vmem [shape: f32[1,10], index: 6, kind: input, shape index: {}]   ;;  %s1172_s7 = inlined_call_operand.hbm [shape: f32[2,10], index: 7, kind: output, shape index: {0}]   ;;  %s1173_s8 = inlined_call_operand.hbm [shape: f32[2,10], index: 8, kind: output, shape index: {1}]  }
   0x1   :  { %v53_v0 = vld [vmem:[%s1166_s1 + $0x80] sm:$0xff]  ;;  %v54_v1 = vld [vmem:[%s1166_s1 + $0x88] sm:$0xff]  ;;  %v55_v11 = vld [vmem:[%s1166_s1 + $0x90] sm:$0xff]  ;;  %v104_v48 = vunpack.c.l.s4 %v813_v47 }
   0x2   :  { %v85_v2 = vld [vmem:[%s1166_s1 + $0x180] sm:$0xff]  ;;  %v657_v3 = vpack.c.bf16 %v54_v1, %v53_v0  ;;  %v86_v4 = vld [vmem:[%s1166_s1 + $0x188] sm:$0xff]  ;;  %v56_v13 = vld [vmem:[%s1166_s1 + $0x98] sm:$0xff]  ;;  %v107_v0 = vshrl.u32 %v106_v49, 7 }
   0x3   :  { %v37_v5 = vld [vmem:[%s1166_s1] sm:$0xff]  ;;  %v38_v6 = vld [vmem:[%s1166_s1 + $0x8] sm:$0xff]  ;;  %v689_v7 = vpack.c.bf16 %v86_v4, %v85_v2  ;;  %v87_v14 = vld [vmem:[%s1166_s1 + $0x190] sm:$0xff]  ;;  %v661_v16 = vpack.c.bf16 %v56_v13, %v55_v11  ;;  %v105_v63 = vunpack.c.0.s8 %v104_v48 }
   0x4   :  { %v659_v8 = vpack.c.bf16 %v38_v6, %v37_v5  ;;  %v69_v9 = vld [vmem:[%s1166_s1 + $0x100] sm:$0xff]  ;;  %v70_v10 = vld [vmem:[%s1166_s1 + $0x108] sm:$0xff]  ;;  %658 = vmatprep.subr.bf16.mxu0 %v657_v3  ;;  %v88_v15 = vld [vmem:[%s1166_s1 + $0x198] sm:$0xff] }
   0x5   :  { %v691_v12 = vpack.c.bf16 %v70_v10, %v69_v9  ;;  %690 = vmatprep.subr.bf16.mxu1 %v689_v7  ;;  %v693_v17 = vpack.c.bf16 %v88_v15, %v87_v14  ;;  %v39_v18 = vld [vmem:[%s1166_s1 + $0x10] sm:$0xff]  ;;  %v40_v19 = vld [vmem:[%s1166_s1 + $0x18] sm:$0xff]  ;;  %v57_v23 = vld [vmem:[%s1166_s1 + $0xa0] sm:$0xff]  ;;  %v108_v13 = vsub.s32 %v105_v63, %v107_v0 }
   0x6   :  { %660 = vmatpush3.bf16.msra.mxu0 %v659_v8  ;;  %v71_v20 = vld [vmem:[%s1166_s1 + $0x110] sm:$0xff]  ;;  %v663_v21 = vpack.c.bf16 %v40_v19, %v39_v18  ;;  %v72_v22 = vld [vmem:[%s1166_s1 + $0x118] sm:$0xff]  ;;  %v58_v24 = vld [vmem:[%s1166_s1 + $0xa8] sm:$0xff] }
   0x7   :  { %692 = vmatpush3.bf16.msra.mxu1 %v691_v12  ;;  %662 = vmatprep.subr.bf16.mxu0 %v661_v16  ;;  %v695_v25 = vpack.c.bf16 %v72_v22, %v71_v20  ;;  %v665_v26 = vpack.c.bf16 %v58_v24, %v57_v23  ;;  %v89_v27 = vld [vmem:[%s1166_s1 + $0x1a0] sm:$0xff]  ;;  %v90_v28 = vld [vmem:[%s1166_s1 + $0x1a8] sm:$0xff]  ;;  %v59_v35 = vld [vmem:[%s1166_s1 + $0xb0] sm:$0xff] }
   0x8   :  { %694 = vmatprep.subr.bf16.mxu1 %v693_v17  ;;  %v41_v29 = vld [vmem:[%s1166_s1 + $0x20] sm:$0xff]  ;;  %v697_v30 = vpack.c.bf16 %v90_v28, %v89_v27  ;;  %v42_v31 = vld [vmem:[%s1166_s1 + $0x28] sm:$0xff]  ;;  %v60_v36 = vld [vmem:[%s1166_s1 + $0xb8] sm:$0xff] }
   0x9   :  { %v73_v32 = vld [vmem:[%s1166_s1 + $0x120] sm:$0xff]  ;;  %v74_v33 = vld [vmem:[%s1166_s1 + $0x128] sm:$0xff]  ;;  %v667_v34 = vpack.c.bf16 %v42_v31, %v41_v29  ;;  %v91_v37 = vld [vmem:[%s1166_s1 + $0x1b0] sm:$0xff]  ;;  %v669_v39 = vpack.c.bf16 %v60_v36, %v59_v35 }
   0xa   :  { %664 = vmatpush3.bf16.msra.mxu0 %v663_v21  ;;  %v699_v38 = vpack.c.bf16 %v74_v33, %v73_v32  ;;  %v92_v40 = vld [vmem:[%s1166_s1 + $0x1b8] sm:$0xff]  ;;  %v43_v41 = vld [vmem:[%s1166_s1 + $0x30] sm:$0xff]  ;;  %v61_v46 = vld [vmem:[%s1166_s1 + $0xc0] sm:$0xff] }
   0xb   :  { %696 = vmatpush3.bf16.msra.mxu1 %v695_v25  ;;  %666 = vmatprep.subr.bf16.mxu0 %v665_v26  ;;  %v44_v42 = vld [vmem:[%s1166_s1 + $0x38] sm:$0xff]  ;;  %v701_v43 = vpack.c.bf16 %v92_v40, %v91_v37  ;;  %v75_v44 = vld [vmem:[%s1166_s1 + $0x130] sm:$0xff]  ;;  %v62_v50 = vld [vmem:[%s1166_s1 + $0xc8] sm:$0xff] }
   0xc   :  { %698 = vmatprep.subr.bf16.mxu1 %v697_v30  ;;  %v76_v45 = vld [vmem:[%s1166_s1 + $0x138] sm:$0xff]  ;;  %v93_v51 = vld [vmem:[%s1166_s1 + $0x1c0] sm:$0xff]  ;;  %v94_v52 = vld [vmem:[%s1166_s1 + $0x1c8] sm:$0xff]  ;;  %v671_v53 = vpack.c.bf16 %v44_v42, %v43_v41  ;;  %v673_v55 = vpack.c.bf16 %v62_v50, %v61_v46 }
   0xd   :  { %v703_v54 = vpack.c.bf16 %v76_v45, %v75_v44  ;;  %v45_v56 = vld [vmem:[%s1166_s1 + $0x40] sm:$0xff]  ;;  %v46_v57 = vld [vmem:[%s1166_s1 + $0x48] sm:$0xff]  ;;  %v705_v59 = vpack.c.bf16 %v94_v52, %v93_v51  ;;  %v63_v61 = vld [vmem:[%s1166_s1 + $0xd0] sm:$0xff] }
   0xe   :  { %668 = vmatpush3.bf16.msra.mxu0 %v667_v34  ;;  %v77_v58 = vld [vmem:[%s1166_s1 + $0x140] sm:$0xff]  ;;  %v78_v60 = vld [vmem:[%s1166_s1 + $0x148] sm:$0xff]  ;;  %v64_v62 = vld [vmem:[%s1166_s1 + $0xd8] sm:$0xff]  ;;  %v675_v3 = vpack.c.bf16 %v46_v57, %v45_v56 }
   0xf   :  { %700 = vmatpush3.bf16.msra.mxu1 %v699_v38  ;;  %670 = vmatprep.subr.bf16.mxu0 %v669_v39  ;;  %v95_v1 = vld [vmem:[%s1166_s1 + $0x1d0] sm:$0xff]  ;;  %v96_v2 = vld [vmem:[%s1166_s1 + $0x1d8] sm:$0xff]  ;;  %v707_v4 = vpack.c.bf16 %v78_v60, %v77_v58  ;;  %v677_v5 = vpack.c.bf16 %v64_v62, %v63_v61  ;;  %v65_v11 = vld [vmem:[%s1166_s1 + $0xe0] sm:$0xff] }
  0x10   :  { %702 = vmatprep.subr.bf16.mxu1 %v701_v43  ;;  %v47_v6 = vld [vmem:[%s1166_s1 + $0x50] sm:$0xff]  ;;  %v48_v7 = vld [vmem:[%s1166_s1 + $0x58] sm:$0xff]  ;;  %v709_v9 = vpack.c.bf16 %v96_v2, %v95_v1  ;;  %v66_v12 = vld [vmem:[%s1166_s1 + $0xe8] sm:$0xff] }
  0x11   :  { %v79_v8 = vld [vmem:[%s1166_s1 + $0x150] sm:$0xff]  ;;  %v80_v10 = vld [vmem:[%s1166_s1 + $0x158] sm:$0xff]  ;;  %v97_v14 = vld [vmem:[%s1166_s1 + $0x1e0] sm:$0xff]  ;;  %v679_v16 = vpack.c.bf16 %v48_v7, %v47_v6  ;;  %v681_v19 = vpack.c.bf16 %v66_v12, %v65_v11 }
  0x12   :  { %672 = vmatpush3.bf16.msra.mxu0 %v671_v53  ;;  %v98_v15 = vld [vmem:[%s1166_s1 + $0x1e8] sm:$0xff]  ;;  %v49_v17 = vld [vmem:[%s1166_s1 + $0x60] sm:$0xff]  ;;  %v711_v18 = vpack.c.bf16 %v80_v10, %v79_v8  ;;  %v67_v25 = vld [vmem:[%s1166_s1 + $0xf0] sm:$0xff] }
  0x13   :  { %704 = vmatpush3.bf16.msra.mxu1 %v703_v54  ;;  %674 = vmatprep.subr.bf16.mxu0 %v673_v55  ;;  %v50_v20 = vld [vmem:[%s1166_s1 + $0x68] sm:$0xff]  ;;  %v81_v21 = vld [vmem:[%s1166_s1 + $0x160] sm:$0xff]  ;;  %v713_v23 = vpack.c.bf16 %v98_v15, %v97_v14  ;;  %v68_v26 = vld [vmem:[%s1166_s1 + $0xf8] sm:$0xff] }
  0x14   :  { %706 = vmatprep.subr.bf16.mxu1 %v705_v59  ;;  %v36_v22 = vld [vmem:[%s1165_s0] sm:$0xff]  ;;  %v82_v24 = vld [vmem:[%s1166_s1 + $0x168] sm:$0xff]  ;;  %v99_v29 = vld [vmem:[%s1166_s1 + $0x1f0] sm:$0xff]  ;;  %v683_v31 = vpack.c.bf16 %v50_v20, %v49_v17 }
  0x15   :  { %v109_v27 = vrot.slane %v36_v22, %v108_v13  ;;  %v102_v28 = vcombine.high %v36_v22, %v36_v22  ;;  %v100_v30 = vld [vmem:[%s1166_s1 + $0x1f8] sm:$0xff] }
  0x16   :  { %676 = vmatpush3.bf16.msra.mxu0 %v675_v3 }
  0x17   :  { %708 = vmatpush3.bf16.msra.mxu1 %v707_v4  ;;  %678 = vmatprep.subr.bf16.mxu0 %v677_v5  ;;  %v117_v32 = vcombine.high %v109_v27, %v109_v27  ;;  %v116_v33 = vrot.slane %v102_v28, %v108_v13 }
  0x18   :  { %710 = vmatprep.subr.bf16.mxu1 %v709_v9 }
  0x1a   :  { %680 = vmatpush3.bf16.msra.mxu0 %v679_v16 }
  0x1b   :  { %15 = vsyncpa [#allocation6], 0  ;;  %712 = vmatpush3.bf16.msra.mxu1 %v711_v18  ;;  %682 = vmatprep.subr.bf16.mxu0 %v681_v19  ;;  %v715_v34 = vpack.c.bf16 %v82_v24, %v81_v21  ;;  %v685_v35 = vpack.c.bf16 %v68_v26, %v67_v25  ;;  %v51_v36 = vld [vmem:[%s1166_s1 + $0x70] sm:$0xff]  ;;  %v52_v37 = vld [vmem:[%s1166_s1 + $0x78] sm:$0xff]  ;;  %v717_v38 = vpack.c.bf16 %v100_v30, %v99_v29  ;;  %v814_v47 = vmov 0.0|0.0  }
  0x1c   :  { %714 = vmatprep.subr.bf16.mxu1 %v713_v23  ;;  %v83_v39 = vld [vmem:[%s1166_s1 + $0x170] sm:$0xff]  ;;  %v84_v40 = vld [vmem:[%s1166_s1 + $0x178] sm:$0xff]  ;;  %187 = vmatprep.mubr.f32.mxu0 %v117_v32  ;;  %v118_v41 = vcombine.high %v116_v33, %v116_v33  ;;  %v687_v42 = vpack.c.bf16 %v52_v37, %v51_v36  ;;  %v277_v44 = vld [vmem:[%s1168_s3] sm:$0xff]  ;;  %v815_v57 = vmov 0.0   ;;  %vm816_vm0 = vmmov 0  }
  0x1d   :  { %v719_v43 = vpack.c.bf16 %v84_v40, %v83_v39  ;;  %v278_v45 = vld [vmem:[%s1168_s3 + $0x8] sm:$0xff]  ;;  %v279_v48 = vld [vmem:[%s1168_s3 + $0x10] sm:$0xff]  ;;  %v280_v49 = vld [vmem:[%s1168_s3 + $0x18] sm:$0xff]  ;;  %34 = vst [vmem:[#allocation2] sm:$0x3] %v815_v57  ;;  %vm388_vm1 = vcmask 1041408  }
  0x1e   :  { %684 = vmatpush3.bf16.msra.mxu0 %v683_v31  ;;  %257 = vmatprep.mubr.f32.mxu1 %v118_v41  ;;  %v722_v46 = vpack.c.bf16 %v278_v45, %v277_v44  ;;  %v725_v50 = vpack.c.bf16 %v280_v49, %v279_v48  ;;  %v281_v51 = vld [vmem:[%s1168_s3 + $0x20] sm:$0xff]  ;;  %v282_v52 = vld [vmem:[%s1168_s3 + $0x28] sm:$0xff]  ;;  %v283_v54 = vld [vmem:[%s1168_s3 + $0x30] sm:$0xff]  ;;  %vm384_vm2 = vcmask 408576   ;;  %vm462_vm3 = vcmask 74752  }
  0x1f   :  { %716 = vmatpush3.bf16.msra.mxu1 %v715_v34  ;;  %686 = vmatprep.subr.bf16.mxu0 %v685_v35  ;;  %v728_v53 = vpack.c.bf16 %v282_v52, %v281_v51  ;;  %v284_v55 = vld [vmem:[%s1168_s3 + $0x38] sm:$0xff]  ;;  %v285_v58 = vld [vmem:[%s1168_s3 + $0x40] sm:$0xff]  ;;  %v286_v59 = vld [vmem:[%s1168_s3 + $0x48] sm:$0xff] }
  0x20   :  { %718 = vmatprep.subr.bf16.mxu1 %v717_v38  ;;  %v731_v56 = vpack.c.bf16 %v284_v55, %v283_v54  ;;  %v734_v60 = vpack.c.bf16 %v286_v59, %v285_v58  ;;  %v287_v61 = vld [vmem:[%s1168_s3 + $0x50] sm:$0xff]  ;;  %v288_v62 = vld [vmem:[%s1168_s3 + $0x58] sm:$0xff]  ;;  %v289_v63 = vld [vmem:[%s1168_s3 + $0x60] sm:$0xff] }
  0x21   :  { %v737_v0 = vpack.c.bf16 %v288_v62, %v287_v61  ;;  %v290_v1 = vld [vmem:[%s1168_s3 + $0x68] sm:$0xff]  ;;  %v291_v3 = vld [vmem:[%s1168_s3 + $0x70] sm:$0xff]  ;;  %v292_v4 = vld [vmem:[%s1168_s3 + $0x78] sm:$0xff] }
  0x22   :  { %688 = vmatpush3.bf16.msra.mxu0 %v687_v42  ;;  %v740_v2 = vpack.c.bf16 %v290_v1, %v289_v63  ;;  %v743_v5 = vpack.c.bf16 %v292_v4, %v291_v3  ;;  %v370_v6 = vld [vmem:[%s1170_s5] sm:$0xff]  ;;  %v371_v7 = vld [vmem:[%s1170_s5 + $0x8] sm:$0xff]  ;;  %v372_v8 = vld [vmem:[%s1170_s5 + $0x10] sm:$0xff] }
  0x23   :  { %720 = vmatpush3.bf16.msra.mxu1 %v719_v43  ;;  %721 = vmatprep.subr.bf16.mxu0 %v814_v47  ;;  %v746_v9 = vpack.c.bf16 %v371_v7, %v370_v6  ;;  %v373_v10 = vld [vmem:[%s1170_s5 + $0x18] sm:$0xff]  ;;  %v374_v12 = vld [vmem:[%s1170_s5 + $0x20] sm:$0xff]  ;;  %v375_v13 = vld [vmem:[%s1170_s5 + $0x28] sm:$0xff] }
  0x24   :  { %745 = vmatprep.subr.bf16.mxu1 %v814_v47  ;;  %v749_v11 = vpack.c.bf16 %v373_v10, %v372_v8  ;;  %v752_v14 = vpack.c.bf16 %v375_v13, %v374_v12  ;;  %v35_v21 = vld [vmem:[#allocation2] sm:$0x3] }
  0x25   :  { %188 = vmatmul.mubr.f32.vlgmr.msra.gmra.mrb[0].mxu0 %v109_v27  ;;  %v505_v24 = vld [vmem:[%s1167_s2] ss:$0 sm:$0xff]  ;;  %v376_v27 = vld [vmem:[%s1170_s5 + $0x30] sm:$0x3] }
  0x26   :  { %258 = vmatmul.mubr.f32.vlgmr.msra.gmra.mrb[0].mxu1 %v116_v33  ;;  %723 = vmatpush3.bf16.msra.mxu0 %v722_v46  ;;  %v506_v28 = vld [vmem:[%s1169_s4] ss:$0 sm:$0xff]  ;;  %s817_s4 = smov [#allocation5]  }
  0x27   :  { %724 = vmatprep.subr.bf16.mxu0 %v814_v47  ;;  %637 = vmatprep.mubr.msk.f32.mxu0 %vm816_vm0, %v815_v57  ;;  %v507_v32 = vld [vmem:[%s1171_s6] ss:$0 sm:$0xff]  ;;  %s493_s5 = sshll.u32 %s817_s4, 4  ;;  %s494_s5 = int_to_ptr.vmem [resolvable:$true] %s493_s5 }
  0x28   :  { %654 = vmatprep.mubr.msk.f32.mxu1 %vm816_vm0, %v815_v57  ;;  %747 = vmatpush3.bf16.msra.mxu1 %v746_v9  ;;  %s765_s6 = scalar_lea.vmem %s494_s5, 32  ;;  %p770_p1 = scmp.lt.s32.totalorder %s494_s5, %s494_s5 }
  0x29   :  { %748 = vmatprep.subr.bf16.mxu1 %v814_v47  ;;  %p766_p0 = scmp.ne.s32.totalorder %s494_s5, %s765_s6  ;;  %p771_p2 = scmp.lt.s32.totalorder %s765_s6, %s765_s6 }
  0x2a   :  { %726 = vmatpush3.bf16.msra.mxu0 %v725_v50 }
  0x2b   :  { %727 = vmatprep.subr.bf16.mxu0 %v814_v47  ;;  %p772_p3 = por %p771_p2, %p770_p1 }
  0x2c   :  { %750 = vmatpush3.bf16.msra.mxu1 %v749_v11 }
  0x2d   :  { %751 = vmatprep.subr.bf16.mxu1 %v814_v47  ;;  %p773_p4 = pnand %p772_p3, %p766_p0 }
  0x2e   :  { %729 = vmatpush3.bf16.msra.mxu0 %v728_v53 }
  0x2f   :  { %730 = vmatprep.subr.bf16.mxu0 %v814_v47 }
  0x30   :  { %753 = vmatpush3.bf16.msra.mxu1 %v752_v14 }
  0x31   :  { %652 = vmatprep.subr.mxu1 %v815_v57 }
  0x32   :  { %732 = vmatpush3.bf16.msra.mxu0 %v731_v56 }
  0x33   :  { %733 = vmatprep.subr.bf16.mxu0 %v814_v47 }
  0x34   :  { %653 = vmatpush3.msk.msra.mxu1 %vm388_vm1, %v376_v27 }
  0x36   :  { %735 = vmatpush3.bf16.msra.mxu0 %v734_v60 }
  0x37   :  { %736 = vmatprep.subr.bf16.mxu0 %v814_v47 }
  0x3a   :  { %738 = vmatpush3.bf16.msra.mxu0 %v737_v0 }
  0x3b   :  { %739 = vmatprep.subr.bf16.mxu0 %v814_v47 }
  0x3e   :  { %741 = vmatpush3.bf16.msra.mxu0 %v740_v2 }
  0x3f   :  { %742 = vmatprep.subr.bf16.mxu0 %v814_v47 }
  0x42   :  { %744 = vmatpush3.bf16.msra.mxu0 %v743_v5 }
  0xf8   :  { %v542_v15 = vpop.f32.mrb[0].mxu0 }
  0xf9   :  { %v577_v16 = vpop.f32.mrb[0].mxu1  ;;  %v543_v17 = vpop.f32.mrb[1].mxu0 }
  0xfa   :  { %v544_v18 = vadd.f32 %v543_v17, %v542_v15  ;;  %v578_v19 = vpop.f32.mrb[1].mxu1 }
  0xfb   :  { %v579_v20 = vadd.f32 %v578_v19, %v577_v16 }
  0xfd   :  { %v260_v22 = vadd.f32 %v579_v20, %v544_v18 }
  0xff   :  { %v263_v23 = vadd.f32 %v260_v22, %v35_v21 }
 0x101   :  { %264 = vst [vmem:[#allocation2] sm:$0x3] %v263_v23 }
 0x108   :  { %v268_v25 = vld [vmem:[#allocation2] sm:$0x3] }
 0x109   :  { %v276_v26 = vadd.f32 %v505_v24, %v268_v25 }
 0x10b   :  { %638 = vmatmul.mubr.f32.vlgmr.msra.gmra.mrb[2].mxu0 %v276_v26 }
 0x1de   :  { %v366_v29 = vpop.f32.mrb[2].mxu0 }
 0x1df   :  { %v367_v30 = vadd.f32 %v506_v28, %v366_v29  ;;  %v639_v31 = vpop.f32.mrb[3].mxu0 }
 0x1e1   :  { %655 = vmatmul.mubr.msk.f32.vlgmr.msra.gmra.mrb[2].mxu1 %vm384_vm2, %v367_v30 }
 0x2b4   :  { %v458_v33 = vpop.f32.mrb[2].mxu1 }
 0x2b5   :  { %v459_v34 = vadd.f32 %v507_v32, %v458_v33  ;;  %v656_v35 = vpop.f32.mrb[3].mxu1 }
 0x2b7   :  { %v464_v36 = vsel %vm462_vm3, %v459_v34, -inf  ;;  %463 = vst.msk [vmem:[#allocation5] sm:$0x3] %vm462_vm3, %v459_v34 }
 0x2b8   :  { %465 = vmax.xlane.f32.xlu0 %v464_v36 }
 0x345   :  { %v466_v37 = vpop.xlane.xlu0 %465 }
 0x346   :  { %v467_v38 = vsub.f32 %v459_v34, %v466_v37 }
 0x348   :  { %v468_v39 = vmul.f32 1.442695, %v467_v38 }
 0x34a   :  { %761 = vpow2.f32 %v468_v39 }
 0x354   :  { %v762_v40 = vpop.eup %761 }
 0x355   :  { %v470_v41 = vsel %vm462_vm3, %v762_v40, 0.0 }
 0x356   :  { %471 = vadd.xlane.f32.xlu0 %v470_v41 }
 0x357   :  { %776 = shalt.err (!%p773_p4)
}
 0x358   :  { %s777_s1 = scalar_lea.hbm %s1173_s8, 32 }
 0x359   :  { %p778_p5 = scmp.ne.s32.totalorder %s1173_s8, %s777_s1  ;;  %p781_p6 = scmp.lt.u32.totalorder %s777_s1, %s1173_s8 }
 0x35b   :  { %p783_p7 = pnand %p781_p6, %p778_p5 }
 0x35d   :  { %786 = shalt.err (!%p783_p7)
}
 0x35e   :  { %496 = dma.vmem_to_hbm [thread:$0]  %s494_s5, 32, %s1173_s8, [#allocation6]  }
 0x35f   :  { %s818_s12 = smov [#allocation3]  }
 0x360   :  { %s483_s13 = sshll.u32 %s818_s12, 4  ;;  %s484_s13 = int_to_ptr.vmem [resolvable:$true] %s483_s13 }
 0x361   :  { %s787_s14 = scalar_lea.vmem %s484_s13, 32  ;;  %p792_p9 = scmp.lt.s32.totalorder %s484_s13, %s484_s13 }
 0x362   :  { %p788_p8 = scmp.ne.s32.totalorder %s484_s13, %s787_s14  ;;  %p793_p10 = scmp.lt.s32.totalorder %s787_s14, %s787_s14 }
 0x364   :  { %p794_p11 = por %p793_p10, %p792_p9 }
 0x366   :  { %p795_p12 = pnand %p794_p11, %p788_p8 }
 0x3e3   :  { %v472_v42 = vpop.xlane.xlu0 %471 }
 0x3e4   :  { %763 = vlog2.f32 %v472_v42 }
 0x3ee   :  { %v764_v43 = vpop.eup %763 }
 0x3ef   :  { %v474_v44 = vmul.f32 0.6931472, %v764_v43 }
 0x3f1   :  { %v475_v45 = vsub.f32 %v467_v38, %v474_v44 }
 0x3f3   :  { %476 = vst.msk [vmem:[#allocation3] sm:$0x3] %vm462_vm3, %v475_v45 }
 0x3f4   :  { %798 = shalt.err (!%p795_p12)
}
 0x3f5   :  { %s799_s8 = scalar_lea.hbm %s1172_s7, 32 }
 0x3f6   :  { %p800_p13 = scmp.ne.s32.totalorder %s1172_s7, %s799_s8  ;;  %p803_p0 = scmp.lt.u32.totalorder %s799_s8, %s1172_s7 }
 0x3f8   :  { %p805_p1 = pnand %p803_p0, %p800_p13 }
 0x3fa   :  { %808 = shalt.err (!%p805_p1)
}
 0x3fb   :  { %486 = dma.vmem_to_hbm [thread:$0]  %s484_s13, 32, %s1172_s7, [#allocation4]  }
 0x3fc   :  { %809 = dma.done.wait [#allocation4], 32  }
 0x3fd   :  { %810 = vsyncadd [#allocation4], 4294967264 }
 0x3fe   :  { %811 = dma.done.wait [#allocation6], 32  }
 0x3ff   :  { %812 = vsyncadd [#allocation6], 4294967264 }
 0x400   :  { %503 = vsyncpa [#allocation4], 1 }
 0x401   :  { %504 = vsyncpa [#allocation6], 1 }

</bundles_post_ra>
